<compile_context>
chip_gen: v7x
topology: tpu7x:2x2x1
jax: 0.10.0
libtpu: 0.0.40
codegen_flags: <defaults>
</compile_context>

<pallas_src>
import jax
import jax.numpy as jnp
from jax import lax
from jax.experimental import pallas as pl
from jax.experimental.pallas import tpu as pltpu


def _round_up(v, m):
    return (v + m - 1) // m * m


def rank_perturb4_kernel(x_ref, w_ref, k1_ref, k2_ref, ms_ref, mr_ref, b_ref,
                         o_ref, acc_ref, h_ref):
    k = pl.program_id(2)

    @pl.when(k == 0)
    def _init():
        acc_ref[...] = jnp.zeros_like(acc_ref)
        h_ref[...] = jnp.zeros_like(h_ref)

    x = x_ref[...]                                          # [tm, tk]

    # Branch 1 partial sum: (x * mask_S) @ W[jtile, ktile]^T  (W kept [out,in])
    acc_ref[...] += lax.dot_general(
        x * ms_ref[...], w_ref[...],
        dimension_numbers=(((1,), (1,)), ((), ())),
        preferred_element_type=jnp.float32)                 # [tm, tn]

    # Branch 2 partial sum: x @ K1[:, ktile]^T -> low-rank hidden
    h_ref[...] += lax.dot_general(
        x, k1_ref[...],
        dimension_numbers=(((1,), (1,)), ((), ())),
        preferred_element_type=jnp.float32)                 # [tm, rank_p]

    @pl.when(k == pl.num_programs(2) - 1)
    def _finalize():
        x2 = lax.dot_general(
            h_ref[...], k2_ref[...],
            dimension_numbers=(((1,), (1,)), ((), ())),
            preferred_element_type=jnp.float32)             # [tm, tn]
        out = acc_ref[...] * mr_ref[...] + b_ref[...] + x2
        o_ref[...] = out.astype(o_ref.dtype)


def rank_perturb4_linear(x, layerW, layerB, mask_S, mask_R, param_S, param_R):
    """x: [B, in]; layerW: [out, in]; layerB: [out];
    mask_S: [in]; mask_R: [out]; param_S: [rank, in]; param_R: [out, rank]."""
    B, in_f = x.shape
    out_f = layerW.shape[0]
    rank = param_S.shape[0]

    # Tile sizes: multiples of (8, 128) for vreg alignment; sized so
    # double-buffered operands stay well inside the 32 MiB scoped VMEM limit.
    tm = min(256, _round_up(B, 8))
    tn = min(256, _round_up(out_f, 128))
    tk = min(512, _round_up(in_f, 128))
    rank_p = max(8, _round_up(rank, 8))

    Bp = _round_up(B, tm)
    inp = _round_up(in_f, tk)
    outp = _round_up(out_f, tn)

    # Exact zero-padding to tile multiples (padded rows/cols sliced off below).
    xp = jnp.pad(x, ((0, Bp - B), (0, inp - in_f)))
    wp = jnp.pad(layerW, ((0, outp - out_f), (0, inp - in_f)))
    k1p = jnp.pad(param_S.reshape(rank, in_f),
                  ((0, rank_p - rank), (0, inp - in_f)))
    k2p = jnp.pad(param_R.reshape(out_f, rank),
                  ((0, outp - out_f), (0, rank_p - rank)))
    msp = jnp.pad(mask_S.reshape(-1), (0, inp - in_f)).reshape(1, inp)
    mrp = jnp.pad(mask_R.reshape(-1), (0, outp - out_f)).reshape(1, outp)
    bp = jnp.pad(layerB.reshape(-1), (0, outp - out_f)).reshape(1, outp)

    grid = (Bp // tm, outp // tn, inp // tk)

    flops = (2 * B * in_f * out_f + 2 * B * in_f * rank
             + 2 * B * rank * out_f + 3 * B * out_f + B * in_f)
    bytes_accessed = 4 * (B * in_f + out_f * in_f + rank * in_f
                          + out_f * rank + in_f + 2 * out_f + B * out_f)

    out = pl.pallas_call(
        rank_perturb4_kernel,
        out_shape=jax.ShapeDtypeStruct((Bp, outp), x.dtype),
        grid=grid,
        in_specs=[
            pl.BlockSpec((tm, tk), lambda i, j, k: (i, k)),       # x
            pl.BlockSpec((tn, tk), lambda i, j, k: (j, k)),       # W   [out, in]
            pl.BlockSpec((rank_p, tk), lambda i, j, k: (0, k)),   # K1  [rank, in]
            pl.BlockSpec((tn, rank_p), lambda i, j, k: (j, 0)),   # K2  [out, rank]
            pl.BlockSpec((1, tk), lambda i, j, k: (0, k)),        # mask_S
            pl.BlockSpec((1, tn), lambda i, j, k: (0, j)),        # mask_R
            pl.BlockSpec((1, tn), lambda i, j, k: (0, j)),        # bias
        ],
        out_specs=pl.BlockSpec((tm, tn), lambda i, j, k: (i, j)),
        scratch_shapes=[
            pltpu.VMEM((tm, tn), jnp.float32),      # main f32 accumulator
            pltpu.VMEM((tm, rank_p), jnp.float32),  # low-rank hidden accumulator
        ],
        compiler_params=pltpu.CompilerParams(
            dimension_semantics=("parallel", "parallel", "arbitrary"),
            vmem_limit_bytes=32 * 1024 * 1024,
        ),
        cost_estimate=pl.CostEstimate(
            flops=flops, transcendentals=0, bytes_accessed=bytes_accessed),
    )(xp, wp, k1p, k2p, msp, mrp, bp)

    return out[:B, :out_f]


def reference(x, layerW, layerB, mask_S, mask_R, param_S, param_R):
    out_f, in_f = layerW.shape
    rank = param_S.shape[0]
    x1 = (x * mask_S.reshape(1, in_f)) @ layerW.T
    x1 = x1 * mask_R.reshape(1, out_f) + layerB.reshape(1, out_f)
    x2 = (x @ param_S.reshape(rank, in_f).T) @ param_R.reshape(out_f, rank).T
    return x1 + x2


def _make_inputs(seed, B, in_f, out_f, rank):
    ks = jax.random.split(jax.random.PRNGKey(seed), 7)
    x       = jax.random.normal(ks[0], (B, in_f), dtype=jnp.float32)
    layerW  = jax.random.normal(ks[1], (out_f, in_f), dtype=jnp.float32) * 0.05
    layerB  = jax.random.normal(ks[2], (out_f,), dtype=jnp.float32) * 0.1
    mask_S  = jax.random.normal(ks[3], (in_f,), dtype=jnp.float32)
    mask_R  = jax.random.normal(ks[4], (out_f,), dtype=jnp.float32)
    param_S = jax.random.normal(ks[5], (rank, in_f), dtype=jnp.float32) * 0.05
    param_R = jax.random.normal(ks[6], (out_f, rank), dtype=jnp.float32) * 0.05
    return x, layerW, layerB, mask_S, mask_R, param_S, param_R


if __name__ == "__main__":
    fwd = jax.jit(rank_perturb4_linear)

    # Case 1: small but multi-tile grid (2 j-tiles, 2 k-tiles) + out padding.
    args = _make_inputs(0, B=16, in_f=1024, out_f=384, rank=4)
    out = jax.block_until_ready(fwd(*args))
    ref = reference(*args)
    assert out.shape == ref.shape == (16, 384)
    err = jnp.max(jnp.abs(out - ref))
    assert jnp.allclose(out, ref, atol=1e-3, rtol=1e-3), f"max err {err}"

    # Case 2: tiny, deliberately unaligned shapes (exercises every padding path).
    args2 = _make_inputs(0, B=10, in_f=96, out_f=48, rank=3)
    out2 = jax.block_until_ready(fwd(*args2))
    ref2 = reference(*args2)
    assert out2.shape == ref2.shape == (10, 48)
    err2 = jnp.max(jnp.abs(out2 - ref2))
    assert jnp.allclose(out2, ref2, atol=1e-3, rtol=1e-3), f"max err {err2}"

    print("KERNEL_OK")
</pallas_src>

<mosaic_0001>
module attributes {stable_mosaic.version = 11 : i64} {
  func.func @rank_perturb4_kernel(%arg0: i32, %arg1: i32, %arg2: i32, %arg3: memref<16x512xf32, #tpu.memory_space<vmem>>, %arg4: memref<256x512xf32, #tpu.memory_space<vmem>>, %arg5: memref<8x512xf32, #tpu.memory_space<vmem>>, %arg6: memref<256x8xf32, #tpu.memory_space<vmem>>, %arg7: memref<1x512xf32, #tpu.memory_space<vmem>>, %arg8: memref<1x256xf32, #tpu.memory_space<vmem>>, %arg9: memref<1x256xf32, #tpu.memory_space<vmem>>, %arg10: memref<16x256xf32, #tpu.memory_space<vmem>>, %arg11: memref<16x256xf32, #tpu.memory_space<vmem>>, %arg12: memref<16x8xf32, #tpu.memory_space<vmem>>) attributes {dimension_semantics = [#tpu.dimension_semantics<parallel>, #tpu.dimension_semantics<parallel>, #tpu.dimension_semantics<arbitrary>], iteration_bounds = array<i64: 1, 2, 2>, scalar_prefetch = 0 : i64, scratch_operands = 2 : i64, tpu.core_type = #tpu.core_type<tc>, window_params = [{transform_indices = @transform_0, window_bounds = array<i64: 16, 512>}, {transform_indices = @transform_1, window_bounds = array<i64: 256, 512>}, {transform_indices = @transform_2, window_bounds = array<i64: 8, 512>}, {transform_indices = @transform_3, window_bounds = array<i64: 256, 8>}, {transform_indices = @transform_4, window_bounds = array<i64: 1, 512>}, {transform_indices = @transform_5, window_bounds = array<i64: 1, 256>}, {transform_indices = @transform_6, window_bounds = array<i64: 1, 256>}, {transform_indices = @transform_7, window_bounds = array<i64: 16, 256>}]} {
    %c0_i32 = arith.constant 0 : i32
    %0 = arith.cmpi eq, %arg2, %c0_i32 : i32
    %1 = arith.extui %0 : i1 to i32
    %c0_i32_0 = arith.constant 0 : i32
    %2 = arith.cmpi ne, %1, %c0_i32_0 : i32
    scf.if %2 {
      %cst_18 = arith.constant 0.000000e+00 : f32
      %20 = vector.broadcast %cst_18 : f32 to vector<16x256xf32>
      %c0_19 = arith.constant 0 : index
      %c0_20 = arith.constant 0 : index
      %21 = vector.load %arg11[%c0_19, %c0_20] : memref<16x256xf32, #tpu.memory_space<vmem>>, vector<16x256xf32>
      tpu.vector_store %arg11[%c0_19, %c0_20], %20 {strides = array<i32>} : memref<16x256xf32, #tpu.memory_space<vmem>>, vector<16x256xf32>,
      %cst_21 = arith.constant 0.000000e+00 : f32
      %22 = vector.broadcast %cst_21 : f32 to vector<16x8xf32>
      %c0_22 = arith.constant 0 : index
      %c0_23 = arith.constant 0 : index
      %23 = vector.load %arg12[%c0_22, %c0_23] : memref<16x8xf32, #tpu.memory_space<vmem>>, vector<16x8xf32>
      tpu.vector_store %arg12[%c0_22, %c0_23], %22 {strides = array<i32>} : memref<16x8xf32, #tpu.memory_space<vmem>>, vector<16x8xf32>,
    } else {
    }
    %c0 = arith.constant 0 : index
    %c0_1 = arith.constant 0 : index
    %3 = vector.load %arg3[%c0, %c0_1] : memref<16x512xf32, #tpu.memory_space<vmem>>, vector<16x512xf32>
    %c0_2 = arith.constant 0 : index
    %c0_3 = arith.constant 0 : index
    %4 = vector.load %arg11[%c0_2, %c0_3] : memref<16x256xf32, #tpu.memory_space<vmem>>, vector<16x256xf32>
    %c0_4 = arith.constant 0 : index
    %c0_5 = arith.constant 0 : index
    %5 = vector.load %arg7[%c0_4, %c0_5] : memref<1x512xf32, #tpu.memory_space<vmem>>, vector<1x512xf32>
    %6 = vector.broadcast %5 : vector<1x512xf32> to vector<16x512xf32>
    %7 = arith.mulf %3, %6 : vector<16x512xf32>
    %c0_6 = arith.constant 0 : index
    %c0_7 = arith.constant 0 : index
    %8 = vector.load %arg4[%c0_6, %c0_7] : memref<256x512xf32, #tpu.memory_space<vmem>>, vector<256x512xf32>
    %cst = arith.constant dense<0.000000e+00> : vector<16x256xf32>
    %9 = tpu.matmul %7, %8, %cst {dimension_numbers = #tpu.dot_dimension_numbers<[1], [1], [0], [0], [0, 0, 1, 0], [], []>} : vector<16x512xf32>, vector<256x512xf32>, vector<16x256xf32> -> vector<16x256xf32>
    %10 = arith.addf %4, %9 : vector<16x256xf32>
    %c0_8 = arith.constant 0 : index
    %c0_9 = arith.constant 0 : index
    %11 = vector.load %arg11[%c0_8, %c0_9] : memref<16x256xf32, #tpu.memory_space<vmem>>, vector<16x256xf32>
    tpu.vector_store %arg11[%c0_8, %c0_9], %10 {strides = array<i32>} : memref<16x256xf32, #tpu.memory_space<vmem>>, vector<16x256xf32>,
    %c0_10 = arith.constant 0 : index
    %c0_11 = arith.constant 0 : index
    %12 = vector.load %arg12[%c0_10, %c0_11] : memref<16x8xf32, #tpu.memory_space<vmem>>, vector<16x8xf32>
    %c0_12 = arith.constant 0 : index
    %c0_13 = arith.constant 0 : index
    %13 = vector.load %arg5[%c0_12, %c0_13] : memref<8x512xf32, #tpu.memory_space<vmem>>, vector<8x512xf32>
    %cst_14 = arith.constant dense<0.000000e+00> : vector<16x8xf32>
    %14 = tpu.matmul %3, %13, %cst_14 {dimension_numbers = #tpu.dot_dimension_numbers<[1], [1], [0], [0], [0, 0, 1, 0], [], []>} : vector<16x512xf32>, vector<8x512xf32>, vector<16x8xf32> -> vector<16x8xf32>
    %15 = arith.addf %12, %14 : vector<16x8xf32>
    %c0_15 = arith.constant 0 : index
    %c0_16 = arith.constant 0 : index
    %16 = vector.load %arg12[%c0_15, %c0_16] : memref<16x8xf32, #tpu.memory_space<vmem>>, vector<16x8xf32>
    tpu.vector_store %arg12[%c0_15, %c0_16], %15 {strides = array<i32>} : memref<16x8xf32, #tpu.memory_space<vmem>>, vector<16x8xf32>,
    %c1_i32 = arith.constant 1 : i32
    %17 = arith.cmpi eq, %arg2, %c1_i32 : i32
    %18 = arith.extui %17 : i1 to i32
    %c0_i32_17 = arith.constant 0 : i32
    %19 = arith.cmpi ne, %18, %c0_i32_17 : i32
    scf.if %19 {
      %c0_18 = arith.constant 0 : index
      %c0_19 = arith.constant 0 : index
      %20 = vector.load %arg12[%c0_18, %c0_19] : memref<16x8xf32, #tpu.memory_space<vmem>>, vector<16x8xf32>
      %c0_20 = arith.constant 0 : index
      %c0_21 = arith.constant 0 : index
      %21 = vector.load %arg6[%c0_20, %c0_21] : memref<256x8xf32, #tpu.memory_space<vmem>>, vector<256x8xf32>
      %cst_22 = arith.constant dense<0.000000e+00> : vector<16x256xf32>
      %22 = tpu.matmul %20, %21, %cst_22 {dimension_numbers = #tpu.dot_dimension_numbers<[1], [1], [0], [0], [0, 0, 1, 0], [], []>} : vector<16x8xf32>, vector<256x8xf32>, vector<16x256xf32> -> vector<16x256xf32>
      %c0_23 = arith.constant 0 : index
      %c0_24 = arith.constant 0 : index
      %23 = vector.load %arg11[%c0_23, %c0_24] : memref<16x256xf32, #tpu.memory_space<vmem>>, vector<16x256xf32>
      %c0_25 = arith.constant 0 : index
      %c0_26 = arith.constant 0 : index
      %24 = vector.load %arg8[%c0_25, %c0_26] : memref<1x256xf32, #tpu.memory_space<vmem>>, vector<1x256xf32>
      %25 = vector.broadcast %24 : vector<1x256xf32> to vector<16x256xf32>
      %26 = arith.mulf %23, %25 : vector<16x256xf32>
      %c0_27 = arith.constant 0 : index
      %c0_28 = arith.constant 0 : index
      %27 = vector.load %arg9[%c0_27, %c0_28] : memref<1x256xf32, #tpu.memory_space<vmem>>, vector<1x256xf32>
      %28 = vector.broadcast %27 : vector<1x256xf32> to vector<16x256xf32>
      %29 = arith.addf %26, %28 : vector<16x256xf32>
      %30 = arith.addf %29, %22 : vector<16x256xf32>
      %c0_29 = arith.constant 0 : index
      %c0_30 = arith.constant 0 : index
      %31 = vector.load %arg10[%c0_29, %c0_30] : memref<16x256xf32, #tpu.memory_space<vmem>>, vector<16x256xf32>
      tpu.vector_store %arg10[%c0_29, %c0_30], %30 {strides = array<i32>} : memref<16x256xf32, #tpu.memory_space<vmem>>, vector<16x256xf32>,
    } else {
    }
    return
  }
  func.func @transform_0(%arg0: i32, %arg1: i32, %arg2: i32) -> (i32, i32) {
    %c0_i32 = arith.constant 0 : i32
    return %arg0, %arg2 : i32, i32
  }
  func.func @transform_1(%arg0: i32, %arg1: i32, %arg2: i32) -> (i32, i32) {
    %c0_i32 = arith.constant 0 : i32
    return %arg1, %arg2 : i32, i32
  }
  func.func @transform_2(%arg0: i32, %arg1: i32, %arg2: i32) -> (i32, i32) {
    %c0_i32 = arith.constant 0 : i32
    %c0_i32_0 = arith.constant 0 : i32
    return %c0_i32, %arg2 : i32, i32
  }
  func.func @transform_3(%arg0: i32, %arg1: i32, %arg2: i32) -> (i32, i32) {
    %c0_i32 = arith.constant 0 : i32
    %c0_i32_0 = arith.constant 0 : i32
    return %arg1, %c0_i32 : i32, i32
  }
  func.func @transform_4(%arg0: i32, %arg1: i32, %arg2: i32) -> (i32, i32) {
    %c0_i32 = arith.constant 0 : i32
    %c0_i32_0 = arith.constant 0 : i32
    return %c0_i32, %arg2 : i32, i32
  }
  func.func @transform_5(%arg0: i32, %arg1: i32, %arg2: i32) -> (i32, i32) {
    %c0_i32 = arith.constant 0 : i32
    %c0_i32_0 = arith.constant 0 : i32
    return %c0_i32, %arg1 : i32, i32
  }
  func.func @transform_6(%arg0: i32, %arg1: i32, %arg2: i32) -> (i32, i32) {
    %c0_i32 = arith.constant 0 : i32
    %c0_i32_0 = arith.constant 0 : i32
    return %c0_i32, %arg1 : i32, i32
  }
  func.func @transform_7(%arg0: i32, %arg1: i32, %arg2: i32) -> (i32, i32) {
    %c0_i32 = arith.constant 0 : i32
    return %arg0, %arg1 : i32, i32
  }
}

</mosaic_0001>

<bundles_post_ra>
// kernel: rank_perturb4_linear.1
= control target key start
LH: loop header
LB: loop body
LE: loop exit
PB: predicated region body
PF: predicated region fallthrough
CT: control target
= control target key end

     0   :  { %s2975_s0 = inlined_call_operand.vmem [shape: f32[16,1024], index: 0, kind: input, shape index: {}]   ;;  %s2976_s1 = inlined_call_operand.vmem [shape: f32[512,1024], index: 1, kind: input, shape index: {}]   ;;  %s2977_s2 = inlined_call_operand.vmem [shape: f32[8,1024], index: 2, kind: input, shape index: {}]   ;;  %s2978_s3 = inlined_call_operand.vmem [shape: f32[512,8], index: 3, kind: input, shape index: {}]   ;;  %s2979_s4 = inlined_call_operand.vmem [shape: f32[1,1024], index: 4, kind: input, shape index: {}]   ;;  %s2980_s5 = inlined_call_operand.vmem [shape: f32[1,512], index: 5, kind: input, shape index: {}]   ;;  %s2981_s6 = inlined_call_operand.vmem [shape: f32[1,512], index: 6, kind: input, shape index: {}]   ;;  %s2982_s7 = inlined_call_operand.vmem [shape: f32[16,512], index: 7, kind: output, shape index: {}]  }
   0x1   :  { %2988 = sst [smem:[#allocation14_spill]] %s2975_s0 }
   0x2   :  { %2989 = sst [smem:[#allocation15_spill]] %s2976_s1 }
   0x3   :  { %2990 = sst [smem:[#allocation16_spill]] %s2977_s2 }
   0x4   :  { %2991 = sst [smem:[#allocation17_spill]] %s2981_s6 }
   0x5   :  { %2992 = sst [smem:[#allocation18_spill]] %s2982_s7 }
   0x6   :  { %s2206_s24 = smov 0   ;;  %s2208_s25 = smov 0  }
   0x7   :  { %s2210_s26 = smov 0   ;;  %s2212_s27 = smov 0  }
   0x8   :  { %s2214_s28 = smov 0   ;;  %s2216_s29 = smov 0  }
   0x9   :  { %s2218_s30 = smov 0   ;;  %s2220_s8 = smov 0  }
   0xa   :  { %s2222_s9 = smov 0   ;;  %s2224_s10 = smov 0  }
   0xb   :  { %s2226_s11 = smov 0  }
   0xc LB: > { %2993 = sst [smem:[#allocation7_spill]] %s2143_s29  ;;  %s1689_s12 = sadd.s32 4294967295, %s2163_s11   ;;  %s2163_s11 = sphi %s2226_s11, %s17_s11   ;;  %s2159_s10 = sphi %s2224_s10, %s3018_s10   ;;  %s2155_s9 = sphi %s2222_s9, %s3017_s9   ;;  %s2151_s8 = sphi %s2220_s8, %s3016_s8   ;;  %s2147_s30 = sphi %s2218_s30, %s3015_s30   ;;  %s2143_s29 = sphi %s2216_s29, %s3014_s29   ;;  %s2139_s28 = sphi %s2214_s28, %s3013_s28   ;;  %s2135_s27 = sphi %s2212_s27, %s3022_s27   ;;  %s2131_s26 = sphi %s2210_s26, %s3021_s26   ;;  %s2127_s25 = sphi %s2208_s25, %s3020_s25   ;;  %s2123_s24 = sphi %s2206_s24, %s3019_s24  }
   0xd   : > { %2994 = sst [smem:[#allocation8_spill]] %s2155_s9  ;;  %s29_s13 = sadd.s32 1, %s2155_s9 }
   0xe   : > { %2995 = sst [smem:[#allocation9_spill]] %s2159_s10  ;;  %p30_p0 = scmp.ge.s32.totalorder %s29_s13, 2 }
   0xf   : > { %s32_s14 = sadd.s32 1, %s2159_s10  ;;  %s45_s15 = sadd.s32 1, %s2143_s29 }
  0x10   : > { %p52_p1 = scmp.ne.s32.totalorder %s2143_s29, %s2139_s28  ;;  %s3024_s13 = smov (%p30_p0, %s29_s13), 0 }
  0x11   : > { %2996 = sst [smem:[#allocation10_spill]] %s3024_s13  ;;  %s3026_s14 = smov (!%p30_p0, %s32_s14), %s2159_s10 }
  0x12   : > { %s41_s16 = ssub.s32 %s2155_s9, %s3024_s13  ;;  %p53_p2 = scmp.eq.s32.totalorder %s2163_s11, 0 }
  0x13   : > { %p34_p3 = scmp.ge.s32.totalorder %s3026_s14, 2  ;;  %p43_p4 = scmp.eq.s32.totalorder %s41_s16, 0 }
  0x14   : > { %p2273_p5 = por %p53_p2, %p52_p1  ;;  %s73_s18 = sadd.s32 1, %s2135_s27 }
  0x15   : > { %s3028_s14 = smov (%p34_p3, %s3026_s14), 0  ;;  %p80_p6 = scmp.ne.s32.totalorder %s2135_s27, %s2131_s26 }
  0x16   : > { %2998 = sst [smem:[#allocation11_spill]] %s3028_s14  ;;  %s68_s20 = ssub.s32 %s2159_s10, %s3028_s14 }
  0x17   : > { %s2281_s19 = scalar_select %p43_p4, %s2143_s29, %s45_s15  }
  0x18   : > { %s70_s21 = sor.u32 %s68_s20, %s41_s16  ;;  %p229_p7 = scmp.eq.s32.totalorder %s68_s20, 0 }
  0x19   : > { %2999 = sst [smem:[#allocation12_spill]] %s2281_s19  ;;  %p71_p8 = scmp.eq.s32.totalorder %s70_s21, 0 }
  0x1a   : > { %p2287_p9 = por %p80_p6, %p53_p2  ;;  %s231_s23 = sadd.s32 1, %s2127_s25 }
  0x1b   : > { %p241_p10 = scmp.ne.s32.totalorder %s2127_s25, %s2123_s24  ;;  %p242_p11 = scmp.eq.s32.totalorder %s1689_s12, 3 }
  0x1c   : > { %s2295_s13 = scalar_select %p71_p8, %s2135_s27, %s73_s18  }
  0x1d   : > { %s2298_s7 = scalar_select %p229_p7, %s2127_s25, %s231_s23  }
  0x1e   : > { %3001 = sst [smem:[#allocation13_spill]] %s2295_s13  ;;  %p2300_p12 = por %p242_p11, %p241_p10 }
  0x1f   : > { %p1692_p13 = scmp.ge.s32.totalorder %s2163_s11, 4 }
  0x21   : > { %264 = sbr.rel (%p1692_p13) target bundleno = 128 (0x80), region = 16 }
  0x28   : > { %267 = sbr.rel (!%p2273_p5) target bundleno = 54 (0x36), region = 20  ;;  %s269_s15 = sand.u32 (%p2273_p5), 1, %s2143_s29  }
  0x29   : > { %s1753_s16 = sshll.u32 (%p2273_p5), %s2155_s9, 5  ;;  %s1693_s20 = sshll.u32 (%p2273_p5), %s269_s15, 6 }
  0x2a   : > { %s3003_s0 = sld [smem:[#allocation14_spill]] (%p2273_p5)  ;;  %s271_s12 = scalar_lea.vmem (%p2273_p5), [#allocation4], %s1693_s20 }
  0x30   : > { %s277_s23 = scalar_lea.vmem %s3003_s0, %s1753_s16 }
  0x31   : > { %v290_v0 = vld [vmem:[%s277_s23] sm:$0xff]  ;;  %v292_v1 = vld [vmem:[%s277_s23 + $0x8] sm:$0xff]  ;;  %v294_v2 = vld [vmem:[%s277_s23 + $0x10] sm:$0xff] }
  0x32   : > { %291 = vst [vmem:[%s271_s12] sm:$0xff] %v290_v0  ;;  %293 = vst [vmem:[%s271_s12 + $0x8] sm:$0xff] %v292_v1  ;;  %v296_v3 = vld [vmem:[%s277_s23 + $0x18] sm:$0xff]  ;;  %v298_v4 = vld [vmem:[%s277_s23 + $0x40] sm:$0xff] }
  0x33   : > { %295 = vst [vmem:[%s271_s12 + $0x10] sm:$0xff] %v294_v2  ;;  %v300_v5 = vld [vmem:[%s277_s23 + $0x48] sm:$0xff]  ;;  %297 = vst [vmem:[%s271_s12 + $0x18] sm:$0xff] %v296_v3  ;;  %v302_v6 = vld [vmem:[%s277_s23 + $0x50] sm:$0xff] }
  0x34   : > { %299 = vst [vmem:[%s271_s12 + $0x20] sm:$0xff] %v298_v4  ;;  %301 = vst [vmem:[%s271_s12 + $0x28] sm:$0xff] %v300_v5  ;;  %v304_v7 = vld [vmem:[%s277_s23 + $0x58] sm:$0xff] }
  0x35   : > { %303 = vst [vmem:[%s271_s12 + $0x30] sm:$0xff] %v302_v6  ;;  %305 = vst [vmem:[%s271_s12 + $0x38] sm:$0xff] %v304_v7 }
  0x36 PF: > { %311 = sbr.rel (!%p2287_p9) target bundleno = 128 (0x80), region = 43  ;;  %s313_s17 = sand.u32 (%p2287_p9), 1, %s2135_s27  }
  0x37   : > { %s1698_s15 = sshll.u32 (%p2287_p9), %s2155_s9, 2  ;;  %s1696_s16 = sshll.u32 (%p2287_p9), %s313_s17, 10 }
  0x38   : > { %s1754_s20 = sshll.u32 (%p2287_p9), %s2159_s10, 8  ;;  %s3004_s1 = sld [smem:[#allocation15_spill]] (%p2287_p9) }
  0x39   : > { %s319_s18 = sadd.s32 (%p2287_p9), %s1754_s20, %s1698_s15  ;;  %s2325_s22 = scalar_lea.vmem (%p2287_p9), [#allocation5], %s1696_s16 }
  0x3a   : > { %s1700_s21 = sshll.u32 (%p2287_p9), %s319_s18, 3 }
  0x3e   : > { %s2320_s19 = scalar_lea.vmem %s3004_s1, %s1700_s21 }
  0x3f   : > { %v334_v8 = vld [vmem:[%s2320_s19] sm:$0xff]  ;;  %v336_v9 = vld [vmem:[%s2320_s19 + $0x8] sm:$0xff]  ;;  %v338_v10 = vld [vmem:[%s2320_s19 + $0x10] sm:$0xff] }
  0x40   : > { %335 = vst [vmem:[%s2325_s22] sm:$0xff] %v334_v8  ;;  %337 = vst [vmem:[%s2325_s22 + $0x8] sm:$0xff] %v336_v9  ;;  %v340_v11 = vld [vmem:[%s2320_s19 + $0x18] sm:$0xff]  ;;  %v342_v12 = vld [vmem:[%s2320_s19 + $0x40] sm:$0xff] }
  0x41   : > { %339 = vst [vmem:[%s2325_s22 + $0x10] sm:$0xff] %v338_v10  ;;  %v344_v13 = vld [vmem:[%s2320_s19 + $0x48] sm:$0xff]  ;;  %341 = vst [vmem:[%s2325_s22 + $0x18] sm:$0xff] %v340_v11  ;;  %v346_v14 = vld [vmem:[%s2320_s19 + $0x50] sm:$0xff] }
  0x42   : > { %343 = vst [vmem:[%s2325_s22 + $0x20] sm:$0xff] %v342_v12  ;;  %345 = vst [vmem:[%s2325_s22 + $0x28] sm:$0xff] %v344_v13  ;;  %v348_v15 = vld [vmem:[%s2320_s19 + $0x58] sm:$0xff]  ;;  %v350_v16 = vld [vmem:[%s2320_s19 + $0x80] sm:$0xff] }
  0x43   : > { %347 = vst [vmem:[%s2325_s22 + $0x30] sm:$0xff] %v346_v14  ;;  %349 = vst [vmem:[%s2325_s22 + $0x38] sm:$0xff] %v348_v15  ;;  %v352_v17 = vld [vmem:[%s2320_s19 + $0x88] sm:$0xff]  ;;  %v354_v18 = vld [vmem:[%s2320_s19 + $0x90] sm:$0xff] }
  0x44   : > { %351 = vst [vmem:[%s2325_s22 + $0x40] sm:$0xff] %v350_v16  ;;  %v356_v19 = vld [vmem:[%s2320_s19 + $0x98] sm:$0xff]  ;;  %353 = vst [vmem:[%s2325_s22 + $0x48] sm:$0xff] %v352_v17  ;;  %v358_v20 = vld [vmem:[%s2320_s19 + $0xc0] sm:$0xff] }
  0x45   : > { %355 = vst [vmem:[%s2325_s22 + $0x50] sm:$0xff] %v354_v18  ;;  %357 = vst [vmem:[%s2325_s22 + $0x58] sm:$0xff] %v356_v19  ;;  %v360_v21 = vld [vmem:[%s2320_s19 + $0xc8] sm:$0xff]  ;;  %v362_v22 = vld [vmem:[%s2320_s19 + $0xd0] sm:$0xff] }
  0x46   : > { %359 = vst [vmem:[%s2325_s22 + $0x60] sm:$0xff] %v358_v20  ;;  %361 = vst [vmem:[%s2325_s22 + $0x68] sm:$0xff] %v360_v21  ;;  %v364_v23 = vld [vmem:[%s2320_s19 + $0xd8] sm:$0xff]  ;;  %v366_v24 = vld [vmem:[%s2320_s19 + $0x100] sm:$0xff] }
  0x47   : > { %363 = vst [vmem:[%s2325_s22 + $0x70] sm:$0xff] %v362_v22  ;;  %v368_v25 = vld [vmem:[%s2320_s19 + $0x108] sm:$0xff]  ;;  %365 = vst [vmem:[%s2325_s22 + $0x78] sm:$0xff] %v364_v23  ;;  %v370_v26 = vld [vmem:[%s2320_s19 + $0x110] sm:$0xff] }
  0x48   : > { %367 = vst [vmem:[%s2325_s22 + $0x80] sm:$0xff] %v366_v24  ;;  %369 = vst [vmem:[%s2325_s22 + $0x88] sm:$0xff] %v368_v25  ;;  %v372_v27 = vld [vmem:[%s2320_s19 + $0x118] sm:$0xff]  ;;  %v374_v28 = vld [vmem:[%s2320_s19 + $0x140] sm:$0xff] }
  0x49   : > { %371 = vst [vmem:[%s2325_s22 + $0x90] sm:$0xff] %v370_v26  ;;  %373 = vst [vmem:[%s2325_s22 + $0x98] sm:$0xff] %v372_v27  ;;  %v376_v29 = vld [vmem:[%s2320_s19 + $0x148] sm:$0xff]  ;;  %v378_v30 = vld [vmem:[%s2320_s19 + $0x150] sm:$0xff] }
  0x4a   : > { %375 = vst [vmem:[%s2325_s22 + $0xa0] sm:$0xff] %v374_v28  ;;  %v380_v31 = vld [vmem:[%s2320_s19 + $0x158] sm:$0xff]  ;;  %377 = vst [vmem:[%s2325_s22 + $0xa8] sm:$0xff] %v376_v29  ;;  %v382_v32 = vld [vmem:[%s2320_s19 + $0x180] sm:$0xff] }
  0x4b   : > { %379 = vst [vmem:[%s2325_s22 + $0xb0] sm:$0xff] %v378_v30  ;;  %381 = vst [vmem:[%s2325_s22 + $0xb8] sm:$0xff] %v380_v31  ;;  %v384_v33 = vld [vmem:[%s2320_s19 + $0x188] sm:$0xff]  ;;  %v386_v34 = vld [vmem:[%s2320_s19 + $0x190] sm:$0xff] }
  0x4c   : > { %383 = vst [vmem:[%s2325_s22 + $0xc0] sm:$0xff] %v382_v32  ;;  %385 = vst [vmem:[%s2325_s22 + $0xc8] sm:$0xff] %v384_v33  ;;  %v388_v35 = vld [vmem:[%s2320_s19 + $0x198] sm:$0xff]  ;;  %v390_v36 = vld [vmem:[%s2320_s19 + $0x1c0] sm:$0xff] }
  0x4d   : > { %387 = vst [vmem:[%s2325_s22 + $0xd0] sm:$0xff] %v386_v34  ;;  %v392_v37 = vld [vmem:[%s2320_s19 + $0x1c8] sm:$0xff]  ;;  %389 = vst [vmem:[%s2325_s22 + $0xd8] sm:$0xff] %v388_v35  ;;  %v394_v38 = vld [vmem:[%s2320_s19 + $0x1d0] sm:$0xff] }
  0x4e   : > { %391 = vst [vmem:[%s2325_s22 + $0xe0] sm:$0xff] %v390_v36  ;;  %393 = vst [vmem:[%s2325_s22 + $0xe8] sm:$0xff] %v392_v37  ;;  %v396_v39 = vld [vmem:[%s2320_s19 + $0x1d8] sm:$0xff]  ;;  %v398_v40 = vld [vmem:[%s2320_s19 + $0x200] sm:$0xff] }
  0x4f   : > { %395 = vst [vmem:[%s2325_s22 + $0xf0] sm:$0xff] %v394_v38  ;;  %397 = vst [vmem:[%s2325_s22 + $0xf8] sm:$0xff] %v396_v39  ;;  %v400_v41 = vld [vmem:[%s2320_s19 + $0x208] sm:$0xff]  ;;  %v402_v42 = vld [vmem:[%s2320_s19 + $0x210] sm:$0xff] }
  0x50   : > { %399 = vst [vmem:[%s2325_s22 + $0x100] sm:$0xff] %v398_v40  ;;  %v404_v43 = vld [vmem:[%s2320_s19 + $0x218] sm:$0xff]  ;;  %401 = vst [vmem:[%s2325_s22 + $0x108] sm:$0xff] %v400_v41  ;;  %v406_v44 = vld [vmem:[%s2320_s19 + $0x240] sm:$0xff] }
  0x51   : > { %403 = vst [vmem:[%s2325_s22 + $0x110] sm:$0xff] %v402_v42  ;;  %405 = vst [vmem:[%s2325_s22 + $0x118] sm:$0xff] %v404_v43  ;;  %v408_v45 = vld [vmem:[%s2320_s19 + $0x248] sm:$0xff]  ;;  %v410_v46 = vld [vmem:[%s2320_s19 + $0x250] sm:$0xff] }
  0x52   : > { %407 = vst [vmem:[%s2325_s22 + $0x120] sm:$0xff] %v406_v44  ;;  %409 = vst [vmem:[%s2325_s22 + $0x128] sm:$0xff] %v408_v45  ;;  %v412_v47 = vld [vmem:[%s2320_s19 + $0x258] sm:$0xff]  ;;  %v414_v48 = vld [vmem:[%s2320_s19 + $0x280] sm:$0xff] }
  0x53   : > { %411 = vst [vmem:[%s2325_s22 + $0x130] sm:$0xff] %v410_v46  ;;  %v416_v49 = vld [vmem:[%s2320_s19 + $0x288] sm:$0xff]  ;;  %413 = vst [vmem:[%s2325_s22 + $0x138] sm:$0xff] %v412_v47  ;;  %v418_v50 = vld [vmem:[%s2320_s19 + $0x290] sm:$0xff] }
  0x54   : > { %415 = vst [vmem:[%s2325_s22 + $0x140] sm:$0xff] %v414_v48  ;;  %417 = vst [vmem:[%s2325_s22 + $0x148] sm:$0xff] %v416_v49  ;;  %v420_v51 = vld [vmem:[%s2320_s19 + $0x298] sm:$0xff]  ;;  %v422_v52 = vld [vmem:[%s2320_s19 + $0x2c0] sm:$0xff] }
  0x55   : > { %419 = vst [vmem:[%s2325_s22 + $0x150] sm:$0xff] %v418_v50  ;;  %421 = vst [vmem:[%s2325_s22 + $0x158] sm:$0xff] %v420_v51  ;;  %v424_v53 = vld [vmem:[%s2320_s19 + $0x2c8] sm:$0xff]  ;;  %v426_v54 = vld [vmem:[%s2320_s19 + $0x2d0] sm:$0xff] }
  0x56   : > { %423 = vst [vmem:[%s2325_s22 + $0x160] sm:$0xff] %v422_v52  ;;  %v428_v55 = vld [vmem:[%s2320_s19 + $0x2d8] sm:$0xff]  ;;  %425 = vst [vmem:[%s2325_s22 + $0x168] sm:$0xff] %v424_v53  ;;  %v430_v56 = vld [vmem:[%s2320_s19 + $0x300] sm:$0xff] }
  0x57   : > { %427 = vst [vmem:[%s2325_s22 + $0x170] sm:$0xff] %v426_v54  ;;  %429 = vst [vmem:[%s2325_s22 + $0x178] sm:$0xff] %v428_v55  ;;  %v432_v57 = vld [vmem:[%s2320_s19 + $0x308] sm:$0xff]  ;;  %v434_v58 = vld [vmem:[%s2320_s19 + $0x310] sm:$0xff] }
  0x58   : > { %431 = vst [vmem:[%s2325_s22 + $0x180] sm:$0xff] %v430_v56  ;;  %433 = vst [vmem:[%s2325_s22 + $0x188] sm:$0xff] %v432_v57  ;;  %v436_v59 = vld [vmem:[%s2320_s19 + $0x318] sm:$0xff]  ;;  %v438_v60 = vld [vmem:[%s2320_s19 + $0x340] sm:$0xff] }
  0x59   : > { %435 = vst [vmem:[%s2325_s22 + $0x190] sm:$0xff] %v434_v58  ;;  %v440_v61 = vld [vmem:[%s2320_s19 + $0x348] sm:$0xff]  ;;  %437 = vst [vmem:[%s2325_s22 + $0x198] sm:$0xff] %v436_v59  ;;  %v442_v62 = vld [vmem:[%s2320_s19 + $0x350] sm:$0xff] }
  0x5a   : > { %439 = vst [vmem:[%s2325_s22 + $0x1a0] sm:$0xff] %v438_v60  ;;  %441 = vst [vmem:[%s2325_s22 + $0x1a8] sm:$0xff] %v440_v61  ;;  %v444_v63 = vld [vmem:[%s2320_s19 + $0x358] sm:$0xff]  ;;  %v446_v0 = vld [vmem:[%s2320_s19 + $0x380] sm:$0xff] }
  0x5b   : > { %443 = vst [vmem:[%s2325_s22 + $0x1b0] sm:$0xff] %v442_v62  ;;  %445 = vst [vmem:[%s2325_s22 + $0x1b8] sm:$0xff] %v444_v63  ;;  %v448_v1 = vld [vmem:[%s2320_s19 + $0x388] sm:$0xff]  ;;  %v450_v2 = vld [vmem:[%s2320_s19 + $0x390] sm:$0xff] }
  0x5c   : > { %447 = vst [vmem:[%s2325_s22 + $0x1c0] sm:$0xff] %v446_v0  ;;  %v452_v3 = vld [vmem:[%s2320_s19 + $0x398] sm:$0xff]  ;;  %449 = vst [vmem:[%s2325_s22 + $0x1c8] sm:$0xff] %v448_v1  ;;  %v454_v4 = vld [vmem:[%s2320_s19 + $0x3c0] sm:$0xff] }
  0x5d   : > { %451 = vst [vmem:[%s2325_s22 + $0x1d0] sm:$0xff] %v450_v2  ;;  %453 = vst [vmem:[%s2325_s22 + $0x1d8] sm:$0xff] %v452_v3  ;;  %v456_v5 = vld [vmem:[%s2320_s19 + $0x3c8] sm:$0xff]  ;;  %v458_v6 = vld [vmem:[%s2320_s19 + $0x3d0] sm:$0xff] }
  0x5e   : > { %455 = vst [vmem:[%s2325_s22 + $0x1e0] sm:$0xff] %v454_v4  ;;  %457 = vst [vmem:[%s2325_s22 + $0x1e8] sm:$0xff] %v456_v5  ;;  %v460_v7 = vld [vmem:[%s2320_s19 + $0x3d8] sm:$0xff]  ;;  %v462_v8 = vld [vmem:[%s2320_s19 + $0x400] sm:$0xff] }
  0x5f   : > { %459 = vst [vmem:[%s2325_s22 + $0x1f0] sm:$0xff] %v458_v6  ;;  %v464_v9 = vld [vmem:[%s2320_s19 + $0x408] sm:$0xff]  ;;  %461 = vst [vmem:[%s2325_s22 + $0x1f8] sm:$0xff] %v460_v7  ;;  %v466_v10 = vld [vmem:[%s2320_s19 + $0x410] sm:$0xff] }
  0x60   : > { %463 = vst [vmem:[%s2325_s22 + $0x200] sm:$0xff] %v462_v8  ;;  %465 = vst [vmem:[%s2325_s22 + $0x208] sm:$0xff] %v464_v9  ;;  %v468_v11 = vld [vmem:[%s2320_s19 + $0x418] sm:$0xff]  ;;  %v470_v12 = vld [vmem:[%s2320_s19 + $0x440] sm:$0xff] }
  0x61   : > { %467 = vst [vmem:[%s2325_s22 + $0x210] sm:$0xff] %v466_v10  ;;  %469 = vst [vmem:[%s2325_s22 + $0x218] sm:$0xff] %v468_v11  ;;  %v472_v13 = vld [vmem:[%s2320_s19 + $0x448] sm:$0xff]  ;;  %v474_v14 = vld [vmem:[%s2320_s19 + $0x450] sm:$0xff] }
  0x62   : > { %471 = vst [vmem:[%s2325_s22 + $0x220] sm:$0xff] %v470_v12  ;;  %v476_v15 = vld [vmem:[%s2320_s19 + $0x458] sm:$0xff]  ;;  %473 = vst [vmem:[%s2325_s22 + $0x228] sm:$0xff] %v472_v13  ;;  %v478_v16 = vld [vmem:[%s2320_s19 + $0x480] sm:$0xff] }
  0x63   : > { %475 = vst [vmem:[%s2325_s22 + $0x230] sm:$0xff] %v474_v14  ;;  %477 = vst [vmem:[%s2325_s22 + $0x238] sm:$0xff] %v476_v15  ;;  %v480_v17 = vld [vmem:[%s2320_s19 + $0x488] sm:$0xff]  ;;  %v482_v18 = vld [vmem:[%s2320_s19 + $0x490] sm:$0xff] }
  0x64   : > { %479 = vst [vmem:[%s2325_s22 + $0x240] sm:$0xff] %v478_v16  ;;  %481 = vst [vmem:[%s2325_s22 + $0x248] sm:$0xff] %v480_v17  ;;  %v484_v19 = vld [vmem:[%s2320_s19 + $0x498] sm:$0xff]  ;;  %v486_v20 = vld [vmem:[%s2320_s19 + $0x4c0] sm:$0xff] }
  0x65   : > { %483 = vst [vmem:[%s2325_s22 + $0x250] sm:$0xff] %v482_v18  ;;  %v488_v21 = vld [vmem:[%s2320_s19 + $0x4c8] sm:$0xff]  ;;  %485 = vst [vmem:[%s2325_s22 + $0x258] sm:$0xff] %v484_v19  ;;  %v490_v22 = vld [vmem:[%s2320_s19 + $0x4d0] sm:$0xff] }
  0x66   : > { %487 = vst [vmem:[%s2325_s22 + $0x260] sm:$0xff] %v486_v20  ;;  %489 = vst [vmem:[%s2325_s22 + $0x268] sm:$0xff] %v488_v21  ;;  %v492_v23 = vld [vmem:[%s2320_s19 + $0x4d8] sm:$0xff]  ;;  %v494_v24 = vld [vmem:[%s2320_s19 + $0x500] sm:$0xff] }
  0x67   : > { %491 = vst [vmem:[%s2325_s22 + $0x270] sm:$0xff] %v490_v22  ;;  %493 = vst [vmem:[%s2325_s22 + $0x278] sm:$0xff] %v492_v23  ;;  %v496_v25 = vld [vmem:[%s2320_s19 + $0x508] sm:$0xff]  ;;  %v498_v26 = vld [vmem:[%s2320_s19 + $0x510] sm:$0xff] }
  0x68   : > { %495 = vst [vmem:[%s2325_s22 + $0x280] sm:$0xff] %v494_v24  ;;  %v500_v27 = vld [vmem:[%s2320_s19 + $0x518] sm:$0xff]  ;;  %497 = vst [vmem:[%s2325_s22 + $0x288] sm:$0xff] %v496_v25  ;;  %v502_v28 = vld [vmem:[%s2320_s19 + $0x540] sm:$0xff] }
  0x69   : > { %499 = vst [vmem:[%s2325_s22 + $0x290] sm:$0xff] %v498_v26  ;;  %501 = vst [vmem:[%s2325_s22 + $0x298] sm:$0xff] %v500_v27  ;;  %v504_v29 = vld [vmem:[%s2320_s19 + $0x548] sm:$0xff]  ;;  %v506_v30 = vld [vmem:[%s2320_s19 + $0x550] sm:$0xff] }
  0x6a   : > { %503 = vst [vmem:[%s2325_s22 + $0x2a0] sm:$0xff] %v502_v28  ;;  %505 = vst [vmem:[%s2325_s22 + $0x2a8] sm:$0xff] %v504_v29  ;;  %v508_v31 = vld [vmem:[%s2320_s19 + $0x558] sm:$0xff]  ;;  %v510_v32 = vld [vmem:[%s2320_s19 + $0x580] sm:$0xff] }
  0x6b   : > { %507 = vst [vmem:[%s2325_s22 + $0x2b0] sm:$0xff] %v506_v30  ;;  %v512_v33 = vld [vmem:[%s2320_s19 + $0x588] sm:$0xff]  ;;  %509 = vst [vmem:[%s2325_s22 + $0x2b8] sm:$0xff] %v508_v31  ;;  %v514_v34 = vld [vmem:[%s2320_s19 + $0x590] sm:$0xff] }
  0x6c   : > { %511 = vst [vmem:[%s2325_s22 + $0x2c0] sm:$0xff] %v510_v32  ;;  %513 = vst [vmem:[%s2325_s22 + $0x2c8] sm:$0xff] %v512_v33  ;;  %v516_v35 = vld [vmem:[%s2320_s19 + $0x598] sm:$0xff]  ;;  %v518_v36 = vld [vmem:[%s2320_s19 + $0x5c0] sm:$0xff] }
  0x6d   : > { %515 = vst [vmem:[%s2325_s22 + $0x2d0] sm:$0xff] %v514_v34  ;;  %517 = vst [vmem:[%s2325_s22 + $0x2d8] sm:$0xff] %v516_v35  ;;  %v520_v37 = vld [vmem:[%s2320_s19 + $0x5c8] sm:$0xff]  ;;  %v522_v38 = vld [vmem:[%s2320_s19 + $0x5d0] sm:$0xff] }
  0x6e   : > { %519 = vst [vmem:[%s2325_s22 + $0x2e0] sm:$0xff] %v518_v36  ;;  %v524_v39 = vld [vmem:[%s2320_s19 + $0x5d8] sm:$0xff]  ;;  %521 = vst [vmem:[%s2325_s22 + $0x2e8] sm:$0xff] %v520_v37  ;;  %v526_v40 = vld [vmem:[%s2320_s19 + $0x600] sm:$0xff] }
  0x6f   : > { %523 = vst [vmem:[%s2325_s22 + $0x2f0] sm:$0xff] %v522_v38  ;;  %525 = vst [vmem:[%s2325_s22 + $0x2f8] sm:$0xff] %v524_v39  ;;  %v528_v41 = vld [vmem:[%s2320_s19 + $0x608] sm:$0xff]  ;;  %v530_v42 = vld [vmem:[%s2320_s19 + $0x610] sm:$0xff] }
  0x70   : > { %527 = vst [vmem:[%s2325_s22 + $0x300] sm:$0xff] %v526_v40  ;;  %529 = vst [vmem:[%s2325_s22 + $0x308] sm:$0xff] %v528_v41  ;;  %v532_v43 = vld [vmem:[%s2320_s19 + $0x618] sm:$0xff]  ;;  %v534_v44 = vld [vmem:[%s2320_s19 + $0x640] sm:$0xff] }
  0x71   : > { %531 = vst [vmem:[%s2325_s22 + $0x310] sm:$0xff] %v530_v42  ;;  %v536_v45 = vld [vmem:[%s2320_s19 + $0x648] sm:$0xff]  ;;  %533 = vst [vmem:[%s2325_s22 + $0x318] sm:$0xff] %v532_v43  ;;  %v538_v46 = vld [vmem:[%s2320_s19 + $0x650] sm:$0xff] }
  0x72   : > { %535 = vst [vmem:[%s2325_s22 + $0x320] sm:$0xff] %v534_v44  ;;  %537 = vst [vmem:[%s2325_s22 + $0x328] sm:$0xff] %v536_v45  ;;  %v540_v47 = vld [vmem:[%s2320_s19 + $0x658] sm:$0xff]  ;;  %v542_v48 = vld [vmem:[%s2320_s19 + $0x680] sm:$0xff] }
  0x73   : > { %539 = vst [vmem:[%s2325_s22 + $0x330] sm:$0xff] %v538_v46  ;;  %541 = vst [vmem:[%s2325_s22 + $0x338] sm:$0xff] %v540_v47  ;;  %v544_v49 = vld [vmem:[%s2320_s19 + $0x688] sm:$0xff]  ;;  %v546_v50 = vld [vmem:[%s2320_s19 + $0x690] sm:$0xff] }
  0x74   : > { %543 = vst [vmem:[%s2325_s22 + $0x340] sm:$0xff] %v542_v48  ;;  %v548_v51 = vld [vmem:[%s2320_s19 + $0x698] sm:$0xff]  ;;  %545 = vst [vmem:[%s2325_s22 + $0x348] sm:$0xff] %v544_v49  ;;  %v550_v52 = vld [vmem:[%s2320_s19 + $0x6c0] sm:$0xff] }
  0x75   : > { %547 = vst [vmem:[%s2325_s22 + $0x350] sm:$0xff] %v546_v50  ;;  %549 = vst [vmem:[%s2325_s22 + $0x358] sm:$0xff] %v548_v51  ;;  %v552_v53 = vld [vmem:[%s2320_s19 + $0x6c8] sm:$0xff]  ;;  %v554_v54 = vld [vmem:[%s2320_s19 + $0x6d0] sm:$0xff] }
  0x76   : > { %551 = vst [vmem:[%s2325_s22 + $0x360] sm:$0xff] %v550_v52  ;;  %553 = vst [vmem:[%s2325_s22 + $0x368] sm:$0xff] %v552_v53  ;;  %v556_v55 = vld [vmem:[%s2320_s19 + $0x6d8] sm:$0xff]  ;;  %v558_v56 = vld [vmem:[%s2320_s19 + $0x700] sm:$0xff] }
  0x77   : > { %555 = vst [vmem:[%s2325_s22 + $0x370] sm:$0xff] %v554_v54  ;;  %v560_v57 = vld [vmem:[%s2320_s19 + $0x708] sm:$0xff]  ;;  %557 = vst [vmem:[%s2325_s22 + $0x378] sm:$0xff] %v556_v55  ;;  %v562_v58 = vld [vmem:[%s2320_s19 + $0x710] sm:$0xff] }
  0x78   : > { %559 = vst [vmem:[%s2325_s22 + $0x380] sm:$0xff] %v558_v56  ;;  %561 = vst [vmem:[%s2325_s22 + $0x388] sm:$0xff] %v560_v57  ;;  %v564_v59 = vld [vmem:[%s2320_s19 + $0x718] sm:$0xff]  ;;  %v566_v60 = vld [vmem:[%s2320_s19 + $0x740] sm:$0xff] }
  0x79   : > { %563 = vst [vmem:[%s2325_s22 + $0x390] sm:$0xff] %v562_v58  ;;  %565 = vst [vmem:[%s2325_s22 + $0x398] sm:$0xff] %v564_v59  ;;  %v568_v61 = vld [vmem:[%s2320_s19 + $0x748] sm:$0xff]  ;;  %v570_v62 = vld [vmem:[%s2320_s19 + $0x750] sm:$0xff] }
  0x7a   : > { %567 = vst [vmem:[%s2325_s22 + $0x3a0] sm:$0xff] %v566_v60  ;;  %v572_v63 = vld [vmem:[%s2320_s19 + $0x758] sm:$0xff]  ;;  %569 = vst [vmem:[%s2325_s22 + $0x3a8] sm:$0xff] %v568_v61  ;;  %v574_v0 = vld [vmem:[%s2320_s19 + $0x780] sm:$0xff] }
  0x7b   : > { %571 = vst [vmem:[%s2325_s22 + $0x3b0] sm:$0xff] %v570_v62  ;;  %573 = vst [vmem:[%s2325_s22 + $0x3b8] sm:$0xff] %v572_v63  ;;  %v576_v1 = vld [vmem:[%s2320_s19 + $0x788] sm:$0xff]  ;;  %v578_v2 = vld [vmem:[%s2320_s19 + $0x790] sm:$0xff] }
  0x7c   : > { %575 = vst [vmem:[%s2325_s22 + $0x3c0] sm:$0xff] %v574_v0  ;;  %577 = vst [vmem:[%s2325_s22 + $0x3c8] sm:$0xff] %v576_v1  ;;  %v580_v3 = vld [vmem:[%s2320_s19 + $0x798] sm:$0xff]  ;;  %v582_v4 = vld [vmem:[%s2320_s19 + $0x7c0] sm:$0xff] }
  0x7d   : > { %579 = vst [vmem:[%s2325_s22 + $0x3d0] sm:$0xff] %v578_v2  ;;  %v584_v5 = vld [vmem:[%s2320_s19 + $0x7c8] sm:$0xff]  ;;  %581 = vst [vmem:[%s2325_s22 + $0x3d8] sm:$0xff] %v580_v3  ;;  %v586_v6 = vld [vmem:[%s2320_s19 + $0x7d0] sm:$0xff] }
  0x7e   : > { %583 = vst [vmem:[%s2325_s22 + $0x3e0] sm:$0xff] %v582_v4  ;;  %585 = vst [vmem:[%s2325_s22 + $0x3e8] sm:$0xff] %v584_v5  ;;  %v588_v7 = vld [vmem:[%s2320_s19 + $0x7d8] sm:$0xff] }
  0x7f   : > { %587 = vst [vmem:[%s2325_s22 + $0x3f0] sm:$0xff] %v586_v6  ;;  %589 = vst [vmem:[%s2325_s22 + $0x3f8] sm:$0xff] %v588_v7 }
  0x80 PF: > { %p1701_p0 = scmp.ge.s32.totalorder %s2163_s11, 1  ;;  %p636_p1 = scmp.lt.s32.totalorder %s2163_s11, 5 }
  0x82   : > { %p637_p2 = pnand %p1701_p0, %p636_p1 }
  0x83   : > { %s643_s0 = sand.u32 (!%p637_p2), 1, %s2139_s28   ;;  %s650_s14 = sand.u32 (!%p637_p2), 1, %s2131_s26  }
  0x84   : > { %640 = sbr.rel (%p637_p2) target bundleno = 763 (0x2fb), region = 86  ;;  %s1702_s23 = sshll.u32 (!%p637_p2), %s643_s0, 6 }
  0x85   : > { %s1703_s19 = sshll.u32 (!%p637_p2), %s650_s14, 10  ;;  %s703_s12 = sand.u32 (!%p637_p2), 1, %s2123_s24  }
  0x86   : > { %s1705_s17 = sshll.u32 (!%p637_p2), %s2147_s30, 2  ;;  %s1704_s15 = sshll.u32 (!%p637_p2), %s703_s12, 5 }
  0x87   : > { %p711_p3 = scmp.lt.s32.totalorder (!%p637_p2), %s1705_s17, 7  ;;  %s1707_s16 = sshll.u32 (!%p637_p2), %s2151_s8, 5 }
  0x88   : > { %p717_p4 = scmp.lt.s32.totalorder (!%p637_p2), %s1707_s16, 63  ;;  %s1710_s20 = sshll.u32 (!%p637_p2), %s2151_s8, 1 }
  0x89   : > { %s3005_s2 = sld [smem:[#allocation16_spill]] (!%p637_p2)  ;;  %p728_p5 = scmp.lt.s32.totalorder (!%p637_p2), %s1710_s20, 3 }
  0x8a   : > { %s2617_s29 = scalar_lea.vmem (!%p637_p2), [#allocation5], %s1703_s19  ;;  %s2619_s13 = scalar_lea.vmem (!%p637_p2), [#allocation6], %s1704_s15 }
  0x8b   : > { %s3030_s17 = smov (!%p711_p3, %s1705_s17), 7  ;;  %s3032_s16 = smov (!%p717_p4, %s1707_s16), 63 }
  0x8c   : > { %s1706_s18 = sshll.u32 %s3030_s17, 3  ;;  %s3034_s20 = smov (!%p728_p5, %s1710_s20), 3 }
  0x8d   : > { %s1708_s24 = sshll.u32 %s3032_s16, 3  ;;  %s730_s22 = scalar_lea.vmem %s2980_s5, %s3034_s20 }
  0x8e   : > { %s2605_s10 = scalar_lea.vmem %s2978_s3, %s1708_s24  ;;  %p1712_p6 = scmp.ne.s32.totalorder %s2147_s30, 0 }
  0x8f   : > { %s2598_s0 = scalar_lea.vmem %s3005_s2, %s1706_s18  ;;  %s3006_s18 = sld [smem:[#allocation17_spill]]  ;;  %vm747_vm0 = vcmask (!%p1712_p6), 64512   ;;  %v2165_v8 = vmov (!%p1712_p6), 0.0  }
  0x90   : > { %s2615_s2 = scalar_lea.vmem [#allocation4], %s1702_s23  ;;  %742 = sbr.rel (%p1712_p6) target bundleno = 151 (0x97), region = 98  ;;  %743 = vst [vmem:[#allocation2] sm:$0xff] (!%p1712_p6), %v2165_v8  ;;  %744 = vst [vmem:[#allocation2 + $0x8] sm:$0xff] (!%p1712_p6), %v2165_v8 }
  0x91   : > { %745 = vst [vmem:[#allocation2 + $0x10] sm:$0xff] (!%p1712_p6), %v2165_v8  ;;  %746 = vst [vmem:[#allocation2 + $0x18] sm:$0xff] (!%p1712_p6), %v2165_v8 }
  0x92   : > { %748 = vst.msk [vmem:[#allocation3] sm:$0xff] (!%p1712_p6), %vm747_vm0, %v2165_v8  ;;  %749 = vst.msk [vmem:[#allocation3 + $0x8] sm:$0xff] (!%p1712_p6), %vm747_vm0, %v2165_v8 }
  0x95   : > { %s735_s26 = scalar_lea.vmem %s3006_s18, %s3034_s20 }
  0x97 PF: > { %v793_v9 = vld [vmem:[%s2617_s29 + $0x8] sm:$0xff]  ;;  %v795_v11 = vld [vmem:[%s2617_s29 + $0x18] sm:$0xff]  ;;  %v792_v14 = vld [vmem:[%s2617_s29] sm:$0xff]  ;;  %v764_v7 = vlaneseq  ;;  %s3007_s23 = scalar_lea.vmem %s2979_s4, %s3030_s17  ;;  %vm1240_vm1 = vcmask 64512   ;;  %p1713_p7 = scmp.ne.s32.totalorder %s2147_s30, 1 }
  0x98   : > { %v797_v10 = vld [vmem:[%s2617_s29 + $0x28] sm:$0xff]  ;;  %v799_v13 = vld [vmem:[%s2617_s29 + $0x38] sm:$0xff]  ;;  %v796_v15 = vld [vmem:[%s2617_s29 + $0x20] sm:$0xff] }
  0x99   : > { %v1792_v12 = vpack.c.bf16 %v797_v10, %v793_v9  ;;  %v1856_v16 = vpack.c.bf16 %v799_v13, %v795_v11  ;;  %v1794_v17 = vpack.c.bf16 %v796_v15, %v792_v14  ;;  %v794_v18 = vld [vmem:[%s2617_s29 + $0x10] sm:$0xff]  ;;  %v801_v20 = vld [vmem:[%s2617_s29 + $0x48] sm:$0xff]  ;;  %v803_v23 = vld [vmem:[%s2617_s29 + $0x58] sm:$0xff] }
  0x9a   : > { %v798_v19 = vld [vmem:[%s2617_s29 + $0x30] sm:$0xff]  ;;  %v805_v22 = vld [vmem:[%s2617_s29 + $0x68] sm:$0xff]  ;;  %v807_v24 = vld [vmem:[%s2617_s29 + $0x78] sm:$0xff] }
  0x9b   : > { %1793 = vmatprep.subr.bf16.mxu1 %v1792_v12  ;;  %v1858_v21 = vpack.c.bf16 %v798_v19, %v794_v18  ;;  %1857 = vmatprep.subr.bf16.mxu0 %v1856_v16  ;;  %v1796_v25 = vpack.c.bf16 %v805_v22, %v801_v20  ;;  %v1860_v26 = vpack.c.bf16 %v807_v24, %v803_v23  ;;  %v800_v27 = vld [vmem:[%s2617_s29 + $0x40] sm:$0xff]  ;;  %v802_v29 = vld [vmem:[%s2617_s29 + $0x50] sm:$0xff]  ;;  %v809_v31 = vld [vmem:[%s2617_s29 + $0x88] sm:$0xff]  ;;  %v765_v12 = vshrl.u32 %v764_v7, 7 }
  0x9c   : > { %1795 = vmatpush1.bf16.xpose.msra.mxu1 %v1794_v17  ;;  %v804_v28 = vld [vmem:[%s2617_s29 + $0x60] sm:$0xff]  ;;  %v806_v30 = vld [vmem:[%s2617_s29 + $0x70] sm:$0xff]  ;;  %v813_v32 = vld [vmem:[%s2617_s29 + $0xa8] sm:$0xff] }
  0x9d   : > { %1859 = vmatpush1.bf16.xpose.msra.mxu0 %v1858_v21  ;;  %1797 = vmatprep.subr.bf16.mxu1 %v1796_v25  ;;  %v811_v33 = vld [vmem:[%s2617_s29 + $0x98] sm:$0xff]  ;;  %v1798_v35 = vpack.c.bf16 %v804_v28, %v800_v27  ;;  %v1862_v36 = vpack.c.bf16 %v806_v30, %v802_v29  ;;  %v1800_v37 = vpack.c.bf16 %v813_v32, %v809_v31  ;;  %v808_v39 = vld [vmem:[%s2617_s29 + $0x80] sm:$0xff]  ;;  %v810_v41 = vld [vmem:[%s2617_s29 + $0x90] sm:$0xff]  ;;  %v2674_v21 = vsub.s32 1, %v765_v12 }
  0x9e   : > { %1861 = vmatprep.subr.bf16.mxu0 %v1860_v26  ;;  %v815_v34 = vld [vmem:[%s2617_s29 + $0xb8] sm:$0xff]  ;;  %v812_v40 = vld [vmem:[%s2617_s29 + $0xa0] sm:$0xff]  ;;  %v814_v42 = vld [vmem:[%s2617_s29 + $0xb0] sm:$0xff]  ;;  %v778_v23 = vsub.s32 3, %v765_v12  ;;  %v2676_v24 = vsub.s32 0, %v765_v12  ;;  %v774_v25 = vsub.s32 2, %v765_v12 }
  0x9f   : > { %v1864_v38 = vpack.c.bf16 %v815_v34, %v811_v33  ;;  %v817_v43 = vld [vmem:[%s2617_s29 + $0xc8] sm:$0xff]  ;;  %v819_v45 = vld [vmem:[%s2617_s29 + $0xd8] sm:$0xff]  ;;  %v1802_v47 = vpack.c.bf16 %v812_v40, %v808_v39  ;;  %v1866_v48 = vpack.c.bf16 %v814_v42, %v810_v41  ;;  %v816_v51 = vld [vmem:[%s2617_s29 + $0xc0] sm:$0xff] }
  0xa0   : > { %v821_v44 = vld [vmem:[%s2617_s29 + $0xe8] sm:$0xff]  ;;  %v823_v46 = vld [vmem:[%s2617_s29 + $0xf8] sm:$0xff]  ;;  %v820_v52 = vld [vmem:[%s2617_s29 + $0xe0] sm:$0xff] }
  0xa1   : > { %v1804_v49 = vpack.c.bf16 %v821_v44, %v817_v43  ;;  %v1868_v50 = vpack.c.bf16 %v823_v46, %v819_v45  ;;  %v818_v53 = vld [vmem:[%s2617_s29 + $0xd0] sm:$0xff]  ;;  %v825_v55 = vld [vmem:[%s2617_s29 + $0x108] sm:$0xff]  ;;  %v827_v57 = vld [vmem:[%s2617_s29 + $0x118] sm:$0xff]  ;;  %v1806_v59 = vpack.c.bf16 %v820_v52, %v816_v51 }
  0xa2   : > { %v822_v54 = vld [vmem:[%s2617_s29 + $0xf0] sm:$0xff]  ;;  %v829_v56 = vld [vmem:[%s2617_s29 + $0x128] sm:$0xff]  ;;  %v831_v58 = vld [vmem:[%s2617_s29 + $0x138] sm:$0xff] }
  0xa3   : > { %v1870_v60 = vpack.c.bf16 %v822_v54, %v818_v53  ;;  %v1808_v61 = vpack.c.bf16 %v829_v56, %v825_v55  ;;  %v1872_v62 = vpack.c.bf16 %v831_v58, %v827_v57  ;;  %v824_v63 = vld [vmem:[%s2617_s29 + $0x100] sm:$0xff]  ;;  %v826_v1 = vld [vmem:[%s2617_s29 + $0x110] sm:$0xff]  ;;  %v833_v3 = vld [vmem:[%s2617_s29 + $0x148] sm:$0xff] }
  0xa4   : > { %1799 = vmatpush1.bf16.xpose.msra.mxu1 %v1798_v35  ;;  %v828_v0 = vld [vmem:[%s2617_s29 + $0x120] sm:$0xff]  ;;  %v830_v2 = vld [vmem:[%s2617_s29 + $0x130] sm:$0xff]  ;;  %v837_v4 = vld [vmem:[%s2617_s29 + $0x168] sm:$0xff] }
  0xa5   : > { %1863 = vmatpush1.bf16.xpose.msra.mxu0 %v1862_v36  ;;  %1801 = vmatprep.subr.bf16.mxu1 %v1800_v37  ;;  %v835_v5 = vld [vmem:[%s2617_s29 + $0x158] sm:$0xff]  ;;  %v1810_v8 = vpack.c.bf16 %v828_v0, %v824_v63  ;;  %v1874_v9 = vpack.c.bf16 %v830_v2, %v826_v1  ;;  %v1812_v10 = vpack.c.bf16 %v837_v4, %v833_v3  ;;  %v832_v13 = vld [vmem:[%s2617_s29 + $0x140] sm:$0xff]  ;;  %v834_v15 = vld [vmem:[%s2617_s29 + $0x150] sm:$0xff] }
  0xa6   : > { %1865 = vmatprep.subr.bf16.mxu0 %v1864_v38  ;;  %v839_v6 = vld [vmem:[%s2617_s29 + $0x178] sm:$0xff]  ;;  %v836_v14 = vld [vmem:[%s2617_s29 + $0x160] sm:$0xff]  ;;  %v838_v16 = vld [vmem:[%s2617_s29 + $0x170] sm:$0xff] }
  0xa7   : > { %v1876_v11 = vpack.c.bf16 %v839_v6, %v835_v5  ;;  %v841_v17 = vld [vmem:[%s2617_s29 + $0x188] sm:$0xff]  ;;  %v843_v19 = vld [vmem:[%s2617_s29 + $0x198] sm:$0xff]  ;;  %v1814_v22 = vpack.c.bf16 %v836_v14, %v832_v13  ;;  %v1878_v26 = vpack.c.bf16 %v838_v16, %v834_v15  ;;  %v762_v30 = vld [vmem:[%s3007_s23] sm:$0xf] }
  0xa8   : > { %v845_v18 = vld [vmem:[%s2617_s29 + $0x1a8] sm:$0xff]  ;;  %v847_v20 = vld [vmem:[%s2617_s29 + $0x1b8] sm:$0xff]  ;;  %v2690_v32 = vrot.slane %v762_v30, %v2674_v21  ;;  %v2692_v33 = vrot.slane %v762_v30, %v778_v23  ;;  %v2695_v34 = vrot.slane %v762_v30, %v2676_v24  ;;  %v2697_v35 = vrot.slane %v762_v30, %v774_v25  ;;  %v840_v36 = vld [vmem:[%s2617_s29 + $0x180] sm:$0xff] }
  0xa9   : > { %v1816_v27 = vpack.c.bf16 %v845_v18, %v841_v17  ;;  %v1880_v28 = vpack.c.bf16 %v847_v20, %v843_v19  ;;  %v2679_v29 = vld [vmem:[%s2615_s2 + $0x8] sm:$0xff]  ;;  %v2687_v31 = vld [vmem:[%s2615_s2 + $0x18] sm:$0xff]  ;;  %v844_v37 = vld [vmem:[%s2617_s29 + $0x1a0] sm:$0xff] }
  0xaa   : > { %v842_v38 = vld [vmem:[%s2617_s29 + $0x190] sm:$0xff]  ;;  %v849_v40 = vld [vmem:[%s2617_s29 + $0x1c8] sm:$0xff]  ;;  %v785_v42 = vmul.f32 %v2690_v32, %v2679_v29  ;;  %v787_v43 = vmul.f32 %v2692_v33, %v2687_v31  ;;  %v851_v44 = vld [vmem:[%s2617_s29 + $0x1d8] sm:$0xff]  ;;  %v1818_v46 = vpack.c.bf16 %v844_v37, %v840_v36 }
  0xab   : > { %v846_v39 = vld [vmem:[%s2617_s29 + $0x1b0] sm:$0xff]  ;;  %v853_v41 = vld [vmem:[%s2617_s29 + $0x1e8] sm:$0xff]  ;;  %v855_v45 = vld [vmem:[%s2617_s29 + $0x1f8] sm:$0xff] }
  0xac   : > { %1803 = vmatpush1.bf16.xpose.msra.mxu1 %v1802_v47  ;;  %984 = vmatprep.mubr.f32.mxu1 %v785_v42  ;;  %v1882_v47 = vpack.c.bf16 %v846_v39, %v842_v38  ;;  %v852_v51 = vld [vmem:[%s2617_s29 + $0x1e0] sm:$0xff]  ;;  %v850_v52 = vld [vmem:[%s2617_s29 + $0x1d0] sm:$0xff]  ;;  %v857_v54 = vld [vmem:[%s2617_s29 + $0x208] sm:$0xff] }
  0xad   : > { %1867 = vmatpush1.bf16.xpose.msra.mxu0 %v1866_v48  ;;  %1805 = vmatprep.subr.bf16.mxu1 %v1804_v49  ;;  %v1820_v48 = vpack.c.bf16 %v853_v41, %v849_v40  ;;  %v1884_v49 = vpack.c.bf16 %v855_v45, %v851_v44  ;;  %v854_v53 = vld [vmem:[%s2617_s29 + $0x1f0] sm:$0xff]  ;;  %v861_v55 = vld [vmem:[%s2617_s29 + $0x228] sm:$0xff]  ;;  %v859_v56 = vld [vmem:[%s2617_s29 + $0x218] sm:$0xff] }
  0xae   : > { %1869 = vmatprep.subr.bf16.mxu0 %v1868_v50  ;;  %1061 = vmatprep.mubr.f32.mxu0 %v787_v43  ;;  %v848_v50 = vld [vmem:[%s2617_s29 + $0x1c0] sm:$0xff]  ;;  %v863_v57 = vld [vmem:[%s2617_s29 + $0x238] sm:$0xff]  ;;  %v858_v0 = vld [vmem:[%s2617_s29 + $0x210] sm:$0xff] }
  0xaf   : > { %v1822_v58 = vpack.c.bf16 %v852_v51, %v848_v50  ;;  %v860_v63 = vld [vmem:[%s2617_s29 + $0x220] sm:$0xff]  ;;  %v862_v1 = vld [vmem:[%s2617_s29 + $0x230] sm:$0xff]  ;;  %v865_v2 = vld [vmem:[%s2617_s29 + $0x248] sm:$0xff] }
  0xb0   : > { %v869_v3 = vld [vmem:[%s2617_s29 + $0x268] sm:$0xff]  ;;  %v867_v4 = vld [vmem:[%s2617_s29 + $0x258] sm:$0xff]  ;;  %v1890_v7 = vpack.c.bf16 %v862_v1, %v858_v0  ;;  %v866_v12 = vld [vmem:[%s2617_s29 + $0x250] sm:$0xff] }
  0xb1   : > { %v871_v5 = vld [vmem:[%s2617_s29 + $0x278] sm:$0xff]  ;;  %v870_v13 = vld [vmem:[%s2617_s29 + $0x270] sm:$0xff]  ;;  %v873_v14 = vld [vmem:[%s2617_s29 + $0x288] sm:$0xff] }
  0xb2   : > { %v877_v15 = vld [vmem:[%s2617_s29 + $0x2a8] sm:$0xff]  ;;  %v875_v16 = vld [vmem:[%s2617_s29 + $0x298] sm:$0xff]  ;;  %v1894_v19 = vpack.c.bf16 %v870_v13, %v866_v12  ;;  %v872_v23 = vld [vmem:[%s2617_s29 + $0x280] sm:$0xff] }
  0xb3   : > { %v879_v17 = vld [vmem:[%s2617_s29 + $0x2b8] sm:$0xff]  ;;  %v1832_v20 = vpack.c.bf16 %v877_v15, %v873_v14  ;;  %v876_v25 = vld [vmem:[%s2617_s29 + $0x2a0] sm:$0xff]  ;;  %v885_v30 = vld [vmem:[%s2617_s29 + $0x2e8] sm:$0xff] }
  0xb4   : > { %1807 = vmatpush1.bf16.xpose.msra.mxu1 %v1806_v59  ;;  %v1886_v59 = vpack.c.bf16 %v854_v53, %v850_v52  ;;  %v883_v36 = vld [vmem:[%s2617_s29 + $0x2d8] sm:$0xff]  ;;  %v1834_v38 = vpack.c.bf16 %v876_v25, %v872_v23  ;;  %v880_v42 = vld [vmem:[%s2617_s29 + $0x2c0] sm:$0xff]  ;;  %v882_v44 = vld [vmem:[%s2617_s29 + $0x2d0] sm:$0xff] }
  0xb5   : > { %1871 = vmatpush1.bf16.xpose.msra.mxu0 %v1870_v60  ;;  %1809 = vmatprep.subr.bf16.mxu1 %v1808_v61  ;;  %v1824_v60 = vpack.c.bf16 %v861_v55, %v857_v54  ;;  %v1888_v61 = vpack.c.bf16 %v863_v57, %v859_v56  ;;  %v887_v37 = vld [vmem:[%s2617_s29 + $0x2f8] sm:$0xff]  ;;  %v884_v43 = vld [vmem:[%s2617_s29 + $0x2e0] sm:$0xff]  ;;  %v886_v45 = vld [vmem:[%s2617_s29 + $0x2f0] sm:$0xff] }
  0xb6   : > { %1873 = vmatprep.subr.bf16.mxu0 %v1872_v62  ;;  %v856_v62 = vld [vmem:[%s2617_s29 + $0x200] sm:$0xff]  ;;  %v1900_v41 = vpack.c.bf16 %v887_v37, %v883_v36  ;;  %v1838_v50 = vpack.c.bf16 %v884_v43, %v880_v42  ;;  %v1902_v51 = vpack.c.bf16 %v886_v45, %v882_v44  ;;  %v890_v56 = vld [vmem:[%s2617_s29 + $0x310] sm:$0xff]  ;;  %v755_v44 = vld [vmem:[%s2615_s2 + $0x28] sm:$0xff] }
  0xb7   : > { %v1826_v6 = vpack.c.bf16 %v860_v63, %v856_v62  ;;  %v888_v54 = vld [vmem:[%s2617_s29 + $0x300] sm:$0xff]  ;;  %v894_v57 = vld [vmem:[%s2617_s29 + $0x330] sm:$0xff]  ;;  %vm2804_vm2 = vmpackc.low (!%p1713_p7), %vm1240_vm1, %vm1240_vm1 }
  0xb8   : > { %v892_v55 = vld [vmem:[%s2617_s29 + $0x320] sm:$0xff]  ;;  %v1906_v63 = vpack.c.bf16 %v894_v57, %v890_v56  ;;  %v914_v36 = vld [vmem:[%s2617_s29 + $0x3d0] sm:$0xff]  ;;  %v759_v57 = vld [vmem:[#allocation2 + $0x8] sm:$0xff] }
  0xb9   : > { %v1842_v62 = vpack.c.bf16 %v892_v55, %v888_v54  ;;  %v904_v14 = vld [vmem:[%s2617_s29 + $0x380] sm:$0xff]  ;;  %v918_v37 = vld [vmem:[%s2617_s29 + $0x3f0] sm:$0xff] }
  0xba   : > { %v908_v15 = vld [vmem:[%s2617_s29 + $0x3a0] sm:$0xff]  ;;  %v752_v43 = vld [vmem:[%s2615_s2 + $0x10] sm:$0xff] }
  0xbb   : > { %v1850_v23 = vpack.c.bf16 %v908_v15, %v904_v14  ;;  %v750_v42 = vld [vmem:[%s2615_s2] sm:$0xff]  ;;  %v1083_v15 = vld [vmem:[#allocation3 + $0x8] sm:$0xff] }
  0xbc   : > { %1811 = vmatpush1.bf16.xpose.msra.mxu1 %v1810_v8  ;;  %v1828_v8 = vpack.c.bf16 %v869_v3, %v865_v2  ;;  %v896_v2 = vld [vmem:[%s2617_s29 + $0x340] sm:$0xff]  ;;  %v784_v45 = vmul.f32 %v2695_v34, %v750_v42 }
  0xbd   : > { %1875 = vmatpush1.bf16.xpose.msra.mxu0 %v1874_v9  ;;  %1813 = vmatprep.subr.bf16.mxu1 %v1812_v10  ;;  %v1892_v9 = vpack.c.bf16 %v871_v5, %v867_v4  ;;  %v864_v10 = vld [vmem:[%s2617_s29 + $0x240] sm:$0xff]  ;;  %v898_v4 = vld [vmem:[%s2617_s29 + $0x350] sm:$0xff] }
  0xbe   : > { %1877 = vmatprep.subr.bf16.mxu0 %v1876_v11  ;;  %v868_v11 = vld [vmem:[%s2617_s29 + $0x260] sm:$0xff]  ;;  %v902_v5 = vld [vmem:[%s2617_s29 + $0x370] sm:$0xff] }
  0xbf   : > { %v1830_v18 = vpack.c.bf16 %v868_v11, %v864_v10  ;;  %v900_v3 = vld [vmem:[%s2617_s29 + $0x360] sm:$0xff]  ;;  %v1910_v11 = vpack.c.bf16 %v902_v5, %v898_v4 }
  0xc0   : > { %v1846_v10 = vpack.c.bf16 %v900_v3, %v896_v2 }
  0xc4   : > { %1815 = vmatpush1.bf16.xpose.msra.mxu1 %v1814_v22  ;;  %v1896_v22 = vpack.c.bf16 %v879_v17, %v875_v16  ;;  %v906_v16 = vld [vmem:[%s2617_s29 + $0x390] sm:$0xff] }
  0xc5   : > { %1879 = vmatpush1.bf16.xpose.msra.mxu0 %v1878_v26  ;;  %1817 = vmatprep.subr.bf16.mxu1 %v1816_v27  ;;  %v874_v26 = vld [vmem:[%s2617_s29 + $0x290] sm:$0xff] }
  0xc6   : > { %1881 = vmatprep.subr.bf16.mxu0 %v1880_v28  ;;  %v878_v27 = vld [vmem:[%s2617_s29 + $0x2b0] sm:$0xff]  ;;  %v881_v28 = vld [vmem:[%s2617_s29 + $0x2c8] sm:$0xff] }
  0xc7   : > { %v1898_v39 = vpack.c.bf16 %v878_v27, %v874_v26  ;;  %v1836_v40 = vpack.c.bf16 %v885_v30, %v881_v28  ;;  %v910_v17 = vld [vmem:[%s2617_s29 + $0x3b0] sm:$0xff]  ;;  %v912_v28 = vld [vmem:[%s2617_s29 + $0x3c0] sm:$0xff] }
  0xc8   : > { %v1914_v25 = vpack.c.bf16 %v910_v17, %v906_v16  ;;  %v916_v30 = vld [vmem:[%s2617_s29 + $0x3e0] sm:$0xff] }
  0xcc   : > { %1819 = vmatpush1.bf16.xpose.msra.mxu1 %v1818_v46  ;;  %v889_v46 = vld [vmem:[%s2617_s29 + $0x308] sm:$0xff] }
  0xcd   : > { %1883 = vmatpush1.bf16.xpose.msra.mxu0 %v1882_v47  ;;  %1821 = vmatprep.subr.bf16.mxu1 %v1820_v48  ;;  %v893_v47 = vld [vmem:[%s2617_s29 + $0x328] sm:$0xff]  ;;  %v891_v48 = vld [vmem:[%s2617_s29 + $0x318] sm:$0xff] }
  0xce   : > { %1885 = vmatprep.subr.bf16.mxu0 %v1884_v49  ;;  %v895_v49 = vld [vmem:[%s2617_s29 + $0x338] sm:$0xff]  ;;  %v1840_v52 = vpack.c.bf16 %v893_v47, %v889_v46  ;;  %v786_v47 = vmul.f32 %v2697_v35, %v752_v43 }
  0xcf   : > { %v1904_v53 = vpack.c.bf16 %v895_v49, %v891_v48  ;;  %v757_v46 = vld [vmem:[%s2615_s2 + $0x38] sm:$0xff]  ;;  %v754_v48 = vld [vmem:[%s2615_s2 + $0x20] sm:$0xff] }
  0xd0   : > { %v1086_v49 = vld [vmem:[%s2598_s0 + $0x10] sm:$0xff]  ;;  %v788_v54 = vmul.f32 %v2695_v34, %v754_v48 }
  0xd4   : > { %1823 = vmatpush1.bf16.xpose.msra.mxu1 %v1822_v58  ;;  %v897_v58 = vld [vmem:[%s2617_s29 + $0x348] sm:$0xff] }
  0xd5   : > { %1887 = vmatpush1.bf16.xpose.msra.mxu0 %v1886_v59  ;;  %1825 = vmatprep.subr.bf16.mxu1 %v1824_v60  ;;  %v901_v59 = vld [vmem:[%s2617_s29 + $0x368] sm:$0xff]  ;;  %v899_v60 = vld [vmem:[%s2617_s29 + $0x358] sm:$0xff] }
  0xd6   : > { %1889 = vmatprep.subr.bf16.mxu0 %v1888_v61  ;;  %v903_v61 = vld [vmem:[%s2617_s29 + $0x378] sm:$0xff]  ;;  %v1844_v0 = vpack.c.bf16 %v901_v59, %v897_v58 }
  0xd7   : > { %v1908_v1 = vpack.c.bf16 %v903_v61, %v899_v60 }
  0xdc   : > { %1827 = vmatpush1.bf16.xpose.msra.mxu1 %v1826_v6  ;;  %v905_v6 = vld [vmem:[%s2617_s29 + $0x388] sm:$0xff] }
  0xdd   : > { %1891 = vmatpush1.bf16.xpose.msra.mxu0 %v1890_v7  ;;  %1829 = vmatprep.subr.bf16.mxu1 %v1828_v8  ;;  %v909_v7 = vld [vmem:[%s2617_s29 + $0x3a8] sm:$0xff]  ;;  %v907_v8 = vld [vmem:[%s2617_s29 + $0x398] sm:$0xff] }
  0xde   : > { %1893 = vmatprep.subr.bf16.mxu0 %v1892_v9  ;;  %v911_v9 = vld [vmem:[%s2617_s29 + $0x3b8] sm:$0xff]  ;;  %v1848_v12 = vpack.c.bf16 %v909_v7, %v905_v6 }
  0xdf   : > { %v1912_v13 = vpack.c.bf16 %v911_v9, %v907_v8  ;;  %v1082_v8 = vld [vmem:[#allocation3] sm:$0xff] }
  0xe4   : > { %1831 = vmatpush1.bf16.xpose.msra.mxu1 %v1830_v18  ;;  %v913_v18 = vld [vmem:[%s2617_s29 + $0x3c8] sm:$0xff] }
  0xe5   : > { %1895 = vmatpush1.bf16.xpose.msra.mxu0 %v1894_v19  ;;  %1833 = vmatprep.subr.bf16.mxu1 %v1832_v20  ;;  %v917_v19 = vld [vmem:[%s2617_s29 + $0x3e8] sm:$0xff]  ;;  %v915_v20 = vld [vmem:[%s2617_s29 + $0x3d8] sm:$0xff] }
  0xe6   : > { %1897 = vmatprep.subr.bf16.mxu0 %v1896_v22  ;;  %v919_v22 = vld [vmem:[%s2617_s29 + $0x3f8] sm:$0xff]  ;;  %v1852_v26 = vpack.c.bf16 %v917_v19, %v913_v18 }
  0xe7   : > { %v1916_v27 = vpack.c.bf16 %v919_v22, %v915_v20  ;;  %v1265_v20 = vld [vmem:[%s2605_s10 + $0x80] sm:$0xff] (!%p1713_p7)  ;;  %v1266_v22 = vld [vmem:[%s2605_s10 + $0x88] sm:$0xff] (!%p1713_p7) }
  0xec   : > { %1835 = vmatpush1.bf16.xpose.msra.mxu1 %v1834_v38  ;;  %v1854_v38 = vpack.c.bf16 %v916_v30, %v912_v28  ;;  %v1267_v28 = vld [vmem:[%s2605_s10 + $0x90] sm:$0xff] (!%p1713_p7) }
  0xed   : > { %1899 = vmatpush1.bf16.xpose.msra.mxu0 %v1898_v39  ;;  %1837 = vmatprep.subr.bf16.mxu1 %v1836_v40  ;;  %v1918_v39 = vpack.c.bf16 %v918_v37, %v914_v36  ;;  %v1087_v40 = vld [vmem:[%s2598_s0 + $0x18] sm:$0xff] }
  0xee   : > { %1901 = vmatprep.subr.bf16.mxu0 %v1900_v41  ;;  %v1085_v41 = vld [vmem:[%s2598_s0 + $0x8] sm:$0xff]  ;;  %v1268_v36 = vld [vmem:[%s2605_s10 + $0x98] sm:$0xff] (!%p1713_p7) }
  0xef   : > { %v1926_v37 = vpack.c.bf16 (!%p1713_p7), %v1268_v36, %v1267_v28 }
  0xf4   : > { %1839 = vmatpush1.bf16.xpose.msra.mxu1 %v1838_v50  ;;  %v789_v50 = vmul.f32 %v2690_v32, %v755_v44 }
  0xf5   : > { %1903 = vmatpush1.bf16.xpose.msra.mxu0 %v1902_v51  ;;  %1841 = vmatprep.subr.bf16.mxu1 %v1840_v52  ;;  %v756_v51 = vld [vmem:[%s2615_s2 + $0x30] sm:$0xff] }
  0xf6   : > { %1905 = vmatprep.subr.bf16.mxu0 %v1904_v53  ;;  %v1084_v52 = vld [vmem:[%s2598_s0] sm:$0xff]  ;;  %v791_v53 = vmul.f32 %v2692_v33, %v757_v46  ;;  %v790_v55 = vmul.f32 %v2697_v35, %v756_v51 }
  0xf7   : > { %v758_v33 = vld [vmem:[#allocation2] sm:$0xff] }
  0xfc   : > { %1843 = vmatpush1.bf16.xpose.msra.mxu1 %v1842_v62 }
  0xfd   : > { %1907 = vmatpush1.bf16.xpose.msra.mxu0 %v1906_v63  ;;  %1845 = vmatprep.subr.bf16.mxu1 %v1844_v0 }
  0xfe   : > { %1909 = vmatprep.subr.bf16.mxu0 %v1908_v1  ;;  %v761_v1 = vld [vmem:[#allocation2 + $0x18] sm:$0xff] }
 0x104   : > { %1847 = vmatpush1.bf16.xpose.msra.mxu1 %v1846_v10 }
 0x105   : > { %1911 = vmatpush1.bf16.xpose.msra.mxu0 %v1910_v11  ;;  %1849 = vmatprep.subr.bf16.mxu1 %v1848_v12 }
 0x106   : > { %1913 = vmatprep.subr.bf16.mxu0 %v1912_v13 }
 0x10c   : > { %1851 = vmatpush1.bf16.xpose.msra.mxu1 %v1850_v23 }
 0x10d   : > { %1915 = vmatpush1.bf16.xpose.msra.mxu0 %v1914_v25  ;;  %1853 = vmatprep.subr.bf16.mxu1 %v1852_v26  ;;  %v1920_v25 = vpack.c.bf16 (!%p1713_p7), %v1266_v22, %v1265_v20  ;;  %v1249_v26 = vld [vmem:[%s2605_s10] sm:$0xff] (!%p1713_p7) }
 0x10e   : > { %1917 = vmatprep.subr.bf16.mxu0 %v1916_v27  ;;  %v1250_v27 = vld [vmem:[%s2605_s10 + $0x8] sm:$0xff] (!%p1713_p7) }
 0x10f   : > { %v1923_v30 = vpack.c.bf16 (!%p1713_p7), %v1250_v27, %v1249_v26 }
 0x114   : > { %1855 = vmatpush1.bf16.xpose.msra.mxu1 %v1854_v38  ;;  %v1251_v38 = vld [vmem:[%s2605_s10 + $0x10] sm:$0xff] (!%p1713_p7) }
 0x115   : > { %1919 = vmatpush1.bf16.xpose.msra.mxu0 %v1918_v39  ;;  %1163 = vmatprep.subr.mxu1 %v1087_v40  ;;  %v1252_v39 = vld [vmem:[%s2605_s10 + $0x18] sm:$0xff] (!%p1713_p7)  ;;  %v1269_v40 = vld [vmem:[%s2605_s10 + $0xa0] sm:$0xff] (!%p1713_p7) }
 0x116   : > { %1088 = vmatprep.subr.mxu0 %v1085_v41  ;;  %v1270_v41 = vld [vmem:[%s2605_s10 + $0xa8] sm:$0xff] (!%p1713_p7) }
 0x11b   : > { %985 = vmatmul.mubr.f32.vlgmr.msra.gmra.mrb[0].mxu1 %v784_v45 }
 0x11c   : > { %1062 = vmatmul.mubr.f32.vlgmr.msra.gmra.mrb[0].mxu0 %v786_v47  ;;  %1164 = vmatpush1.xpose.msra.mxu1 %v1086_v49  ;;  %v1254_v47 = vld [vmem:[%s2605_s10 + $0x28] sm:$0xff] (!%p1713_p7)  ;;  %v1272_v49 = vld [vmem:[%s2605_s10 + $0xb8] sm:$0xff] (!%p1713_p7) }
 0x11d   : > { %1089 = vmatpush1.xpose.msra.mxu0 %v1084_v52  ;;  %990 = vmatprep.mubr.f32.mxu1 %v789_v50  ;;  %v1255_v52 = vld [vmem:[%s2605_s10 + $0x30] sm:$0xff] (!%p1713_p7) }
 0x11e   : > { %1067 = vmatprep.mubr.f32.mxu0 %v791_v53  ;;  %1922 = vmatprep.subr.msk.bf16.mxu0 (!%p1713_p7), %vm2804_vm2, %v1920_v25  ;;  %v1256_v53 = vld [vmem:[%s2605_s10 + $0x38] sm:$0xff] (!%p1713_p7) }
 0x11f   : > { %991 = vmatmul.mubr.f32.gmra.mrb[2].mxu1 %v788_v54  ;;  %1972 = vmatprep.subr.msk.bf16.mxu1 (!%p1713_p7), %vm2804_vm2, %v1920_v25  ;;  %v1273_v54 = vld [vmem:[%s2605_s10 + $0xc0] sm:$0xff] (!%p1713_p7) }
 0x120   : > { %1068 = vmatmul.mubr.f32.gmra.mrb[2].mxu0 %v790_v55  ;;  %1227 = vmatprep.mubr.f32.mxu1 %v2687_v31  ;;  %v760_v31 = vld [vmem:[#allocation2 + $0x10] sm:$0xff]  ;;  %v1274_v55 = vld [vmem:[%s2605_s10 + $0xc8] sm:$0xff] (!%p1713_p7) }
 0x121   : > { %1152 = vmatprep.mubr.f32.mxu0 %v2679_v29 }
 0x123   : > { %1228 = vmatmul.mubr.f32.vlgmr.msra.gmra.mrb[4].mxu1 %v752_v43  ;;  %v1932_v43 = vpack.c.bf16 (!%p1713_p7), %v1270_v41, %v1269_v40 }
 0x124   : > { %1153 = vmatmul.mubr.f32.vlgmr.msra.gmra.mrb[4].mxu0 %v750_v42  ;;  %1232 = vmatprep.mubr.f32.mxu1 %v757_v46  ;;  %v1929_v42 = vpack.c.bf16 (!%p1713_p7), %v1252_v39, %v1251_v38  ;;  %v1253_v46 = vld [vmem:[%s2605_s10 + $0x20] sm:$0xff] (!%p1713_p7) }
 0x125   : > { %1157 = vmatprep.mubr.f32.mxu0 %v755_v44  ;;  %1925 = vmatpush3.bf16.xpose.msk.msra.mxu0 (!%p1713_p7), %vm2804_vm2, %v1923_v30  ;;  %v1935_v50 = vpack.c.bf16 (!%p1713_p7), %v1254_v47, %v1253_v46 }
 0x126   : > { %1980 = vmatpush3.bf16.xpose.msk.msra.mxu1 (!%p1713_p7), %vm2804_vm2, %v1923_v30  ;;  %1928 = vmatprep.subr.msk.bf16.mxu0 (!%p1713_p7), %vm2804_vm2, %v1926_v37 }
 0x127   : > { %1233 = vmatmul.mubr.f32.gmra.mrb[6].mxu1 %v756_v51  ;;  %1973 = vmatprep.subr.msk.bf16.mxu1 (!%p1713_p7), %vm2804_vm2, %v1926_v37 }
 0x128   : > { %1158 = vmatmul.mubr.f32.gmra.mrb[6].mxu0 %v754_v48  ;;  %v1271_v48 = vld [vmem:[%s2605_s10 + $0xb0] sm:$0xff] (!%p1713_p7) }
 0x129   : > { %v1938_v51 = vpack.c.bf16 (!%p1713_p7), %v1272_v49, %v1271_v48 }
 0x12d   : > { %1931 = vmatpush3.bf16.xpose.msk.msra.mxu0 (!%p1713_p7), %vm2804_vm2, %v1929_v42 }
 0x12e   : > { %1981 = vmatpush3.bf16.xpose.msk.msra.mxu1 (!%p1713_p7), %vm2804_vm2, %v1929_v42  ;;  %1934 = vmatprep.subr.msk.bf16.mxu0 (!%p1713_p7), %vm2804_vm2, %v1932_v43 }
 0x12f   : > { %1974 = vmatprep.subr.msk.bf16.mxu1 (!%p1713_p7), %vm2804_vm2, %v1932_v43 }
 0x135   : > { %1937 = vmatpush3.bf16.xpose.msk.msra.mxu0 (!%p1713_p7), %vm2804_vm2, %v1935_v50 }
 0x136   : > { %1982 = vmatpush3.bf16.xpose.msk.msra.mxu1 (!%p1713_p7), %vm2804_vm2, %v1935_v50  ;;  %1940 = vmatprep.subr.msk.bf16.mxu0 (!%p1713_p7), %vm2804_vm2, %v1938_v51 }
 0x137   : > { %1975 = vmatprep.subr.msk.bf16.mxu1 (!%p1713_p7), %vm2804_vm2, %v1938_v51 }
 0x1ee   : > { %v986_v32 = vpop.f32.mrb[0].mxu1 }
 0x1ef   : > { %v1063_v34 = vpop.f32.mrb[0].mxu0  ;;  %v988_v56 = vpop.f32.mrb[1].mxu1 }
 0x1f0   : > { %v1064_v35 = vadd.f32 %v1063_v34, %v986_v32  ;;  %v1065_v58 = vpop.f32.mrb[1].mxu0  ;;  %v1941_v32 = vpack.c.bf16 (!%p1713_p7), %v1256_v53, %v1255_v52  ;;  %v1257_v34 = vld [vmem:[%s2605_s10 + $0x40] sm:$0xff] (!%p1713_p7) }
 0x1f1   : > { %v1066_v59 = vadd.f32 %v1065_v58, %v988_v56  ;;  %v1258_v56 = vld [vmem:[%s2605_s10 + $0x48] sm:$0xff] (!%p1713_p7) }
 0x1f2   : > { %v1074_v60 = vadd.f32 %v1064_v35, %v758_v33  ;;  %v992_v61 = vpop.f32.mrb[2].mxu1  ;;  %v1944_v33 = vpack.c.bf16 (!%p1713_p7), %v1274_v55, %v1273_v54  ;;  %1943 = vmatpush3.bf16.xpose.msk.msra.mxu0 (!%p1713_p7), %vm2804_vm2, %v1941_v32  ;;  %1983 = vmatpush3.bf16.xpose.msk.msra.mxu1 (!%p1713_p7), %vm2804_vm2, %v1941_v32  ;;  %v1275_v35 = vld [vmem:[%s2605_s10 + $0xd0] sm:$0xff] (!%p1713_p7)  ;;  %v1947_v58 = vpack.c.bf16 (!%p1713_p7), %v1258_v56, %v1257_v34 }
 0x1f3   : > { %v1075_v62 = vadd.f32 %v1066_v59, %v759_v57  ;;  %v1069_v63 = vpop.f32.mrb[2].mxu0  ;;  %v994_v29 = vpop.f32.mrb[3].mxu1  ;;  %v1276_v57 = vld [vmem:[%s2605_s10 + $0xd8] sm:$0xff] (!%p1713_p7) }
 0x1f4   : > { %1078 = vst [vmem:[#allocation2] sm:$0xff] %v1074_v60  ;;  %v1070_v0 = vadd.f32 %v1069_v63, %v992_v61  ;;  %v1071_v2 = vpop.f32.mrb[3].mxu0  ;;  %1946 = vmatprep.subr.msk.bf16.mxu0 (!%p1713_p7), %vm2804_vm2, %v1944_v33  ;;  %1976 = vmatprep.subr.msk.bf16.mxu1 (!%p1713_p7), %vm2804_vm2, %v1944_v33  ;;  %v1950_v59 = vpack.c.bf16 (!%p1713_p7), %v1276_v57, %v1275_v35  ;;  %v1259_v60 = vld [vmem:[%s2605_s10 + $0x50] sm:$0xff] (!%p1713_p7)  ;;  %v1260_v61 = vld [vmem:[%s2605_s10 + $0x58] sm:$0xff] (!%p1713_p7) }
 0x1f5   : > { %1079 = vst [vmem:[#allocation2 + $0x8] sm:$0xff] %v1075_v62  ;;  %v1072_v3 = vadd.f32 %v1071_v2, %v994_v29  ;;  %v1277_v62 = vld [vmem:[%s2605_s10 + $0xe0] sm:$0xff] (!%p1713_p7)  ;;  %v1953_v63 = vpack.c.bf16 (!%p1713_p7), %v1260_v61, %v1259_v60  ;;  %v1279_v2 = vld [vmem:[%s2605_s10 + $0xf0] sm:$0xff] (!%p1713_p7) }
 0x1f6   : > { %v1076_v4 = vadd.f32 %v1070_v0, %v760_v31  ;;  %v1229_v5 = vpop.f32.mrb[4].mxu1  ;;  %v1278_v31 = vld [vmem:[%s2605_s10 + $0xe8] sm:$0xff] (!%p1713_p7)  ;;  %v1261_v0 = vld [vmem:[%s2605_s10 + $0x60] sm:$0xff] (!%p1713_p7) }
 0x1f7   : > { %v1077_v6 = vadd.f32 %v1072_v3, %v761_v1  ;;  %v1154_v7 = vpop.f32.mrb[4].mxu0  ;;  %v1231_v9 = vpop.f32.mrb[5].mxu1  ;;  %v1956_v29 = vpack.c.bf16 (!%p1713_p7), %v1278_v31, %v1277_v62  ;;  %v1262_v1 = vld [vmem:[%s2605_s10 + $0x68] sm:$0xff] (!%p1713_p7)  ;;  %v1280_v3 = vld [vmem:[%s2605_s10 + $0xf8] sm:$0xff] (!%p1713_p7) }
 0x1f8   : > { %1080 = vst [vmem:[#allocation2 + $0x10] sm:$0xff] %v1076_v4  ;;  %v1230_v10 = vadd.f32 %v1229_v5, %v1154_v7  ;;  %v1156_v11 = vpop.f32.mrb[5].mxu0  ;;  %v1959_v4 = vpack.c.bf16 (!%p1713_p7), %v1262_v1, %v1261_v0  ;;  %v1962_v5 = vpack.c.bf16 (!%p1713_p7), %v1280_v3, %v1279_v2  ;;  %v1264_v7 = vld [vmem:[%s2605_s10 + $0x78] sm:$0xff] (!%p1713_p7)  ;;  %v1464_v9 = vld [vmem:[%s730_s22] sm:$0x3] (!%p1713_p7) }
 0x1f9   : > { %1081 = vst [vmem:[#allocation2 + $0x18] sm:$0xff] %v1077_v6  ;;  %v1263_v6 = vld [vmem:[%s2605_s10 + $0x70] sm:$0xff] (!%p1713_p7) }
 0x1fa   : > { %v1238_v12 = vadd.f32 %v1230_v10, %v1082_v8  ;;  %v1234_v13 = vpop.f32.mrb[6].mxu1  ;;  %1246 = sbr.rel (%p1713_p7) target bundleno = 753 (0x2f1), region = 102  ;;  %1949 = vmatpush3.bf16.xpose.msk.msra.mxu0 (!%p1713_p7), %vm2804_vm2, %v1947_v58  ;;  %1984 = vmatpush3.bf16.xpose.msk.msra.mxu1 (!%p1713_p7), %vm2804_vm2, %v1947_v58  ;;  %v1965_v8 = vpack.c.bf16 (!%p1713_p7), %v1264_v7, %v1263_v6  ;;  %v1469_v10 = vrot.slane (!%p1713_p7), %v1464_v9, %v2676_v24 }
 0x1fb   : > { %v1159_v14 = vpop.f32.mrb[6].mxu0  ;;  %v1236_v16 = vpop.f32.mrb[7].mxu1  ;;  %1952 = vmatprep.subr.msk.bf16.mxu0 (!%p1713_p7), %vm2804_vm2, %v1950_v59  ;;  %1977 = vmatprep.subr.msk.bf16.mxu1 (!%p1713_p7), %vm2804_vm2, %v1950_v59  ;;  %v1460_v11 = vld [vmem:[#allocation2] sm:$0xff] (!%p1713_p7) }
 0x1fc   : > { %1241 = vst.msk [vmem:[#allocation3] sm:$0xff] %vm1240_vm1, %v1238_v12  ;;  %v1235_v17 = vadd.f32 %v1234_v13, %v1159_v14  ;;  %v1161_v18 = vpop.f32.mrb[7].mxu0  ;;  %v1480_v12 = vld [vmem:[%s735_s26] sm:$0x3] (!%p1713_p7)  ;;  %v1473_v14 = vrot.slane (!%p1713_p7), %v1464_v9, %v2674_v21 }
 0x1fd   : > { %v1485_v18 = vrot.slane (!%p1713_p7), %v1480_v12, %v2676_v24  ;;  %v1489_v22 = vrot.slane (!%p1713_p7), %v1480_v12, %v2674_v21 }
 0x1fe   : > { %v1239_v19 = vadd.f32 %v1235_v17, %v1083_v15  ;;  %v1461_v15 = vld [vmem:[#allocation2 + $0x8] sm:$0xff] (!%p1713_p7)  ;;  %v1476_v17 = vmul.f32 (!%p1713_p7), %v1469_v10, %v1460_v11 }
 0x1ff   : > { %v1462_v13 = vld [vmem:[#allocation2 + $0x10] sm:$0xff] (!%p1713_p7)  ;;  %v1477_v20 = vmul.f32 (!%p1713_p7), %v1473_v14, %v1461_v15 }
 0x200   : > { %1242 = vst.msk [vmem:[#allocation3 + $0x8] sm:$0xff] %vm1240_vm1, %v1239_v19  ;;  %v1463_v16 = vld [vmem:[#allocation2 + $0x18] sm:$0xff] (!%p1713_p7)  ;;  %v1478_v19 = vmul.f32 (!%p1713_p7), %v1469_v10, %v1462_v13  ;;  %v1492_v25 = vadd.f32 (!%p1713_p7), %v1485_v18, %v1476_v17 }
 0x201   : > { %v1479_v23 = vmul.f32 %v1473_v14, %v1463_v16  ;;  %v1493_v27 = vadd.f32 %v1489_v22, %v1477_v20 }
 0x202   : > { %1955 = vmatpush3.bf16.xpose.msk.msra.mxu0 %vm2804_vm2, %v1953_v63  ;;  %1985 = vmatpush3.bf16.xpose.msk.msra.mxu1 %vm2804_vm2, %v1953_v63  ;;  %v1494_v26 = vadd.f32 %v1485_v18, %v1478_v19 }
 0x203   : > { %v2828_v44 = vld [vmem:[#allocation3] sm:$0xff]  ;;  %1958 = vmatprep.subr.msk.bf16.mxu0 %vm2804_vm2, %v1956_v29  ;;  %1978 = vmatprep.subr.msk.bf16.mxu1 %vm2804_vm2, %v1956_v29  ;;  %v1495_v28 = vadd.f32 %v1489_v22, %v1479_v23 }
 0x204   : > { %1788 = vmatprep.mubr.msk.f32.mxu0 %vm1240_vm1, %v2828_v44 }
 0x207   : > { %v2830_v45 = vld [vmem:[#allocation3 + $0x8] sm:$0xff] }
 0x208   : > { %1790 = vmatprep.mubr.msk.f32.mxu1 %vm1240_vm1, %v2830_v45 }
 0x20a   : > { %1961 = vmatpush3.bf16.xpose.msk.msra.mxu0 %vm2804_vm2, %v1959_v4  ;;  %1986 = vmatpush3.bf16.xpose.msk.msra.mxu1 %vm2804_vm2, %v1959_v4 }
 0x20b   : > { %1964 = vmatprep.subr.msk.bf16.mxu0 %vm2804_vm2, %v1962_v5  ;;  %1979 = vmatprep.subr.msk.bf16.mxu1 %vm2804_vm2, %v1962_v5 }
 0x212   : > { %1967 = vmatpush3.bf16.xpose.msk.msra.mxu0 %vm2804_vm2, %v1965_v8  ;;  %1987 = vmatpush3.bf16.xpose.msk.msra.mxu1 %vm2804_vm2, %v1965_v8 }
 0x219   : > { %1789 = vmatmul.mubr.msk.f32.vlgmr.msra.gmra.mrb[0].mxu0 %vm1240_vm1, %v2828_v44  ;;  %1791 = vmatmul.mubr.msk.f32.vlgmr.msra.gmra.mrb[0].mxu1 %vm1240_vm1, %v2830_v45 }
 0x2ec   : > { %v1449_v30 = vpop.f32.mrb[0].mxu0  ;;  %v1455_v36 = vpop.f32.mrb[0].mxu1 }
 0x2ed   : > { %v1496_v37 = vadd.f32 %v1492_v25, %v1449_v30  ;;  %v1498_v38 = vadd.f32 %v1494_v26, %v1455_v36  ;;  %v1451_v39 = vpop.f32.mrb[1].mxu0  ;;  %v1457_v40 = vpop.f32.mrb[1].mxu1 }
 0x2ee   : > { %v1497_v24 = vadd.f32 %v1493_v27, %v1451_v39  ;;  %v1499_v41 = vadd.f32 %v1495_v28, %v1457_v40 }
 0x2ef   : > { %1500 = vst [vmem:[%s2619_s13] sm:$0xff] %v1496_v37  ;;  %1502 = vst [vmem:[%s2619_s13 + $0x10] sm:$0xff] %v1498_v38 }
 0x2f0   : > { %1501 = vst [vmem:[%s2619_s13 + $0x8] sm:$0xff] %v1497_v24  ;;  %1503 = vst [vmem:[%s2619_s13 + $0x18] sm:$0xff] %v1499_v41 }
 0x2f1 PF: > { %1510 = sbr.rel (!%p2300_p12) target bundleno = 763 (0x2fb), region = 106  ;;  %s1755_s17 = sshll.u32 (%p2300_p12), %s2151_s8, 4 }
 0x2f2   : > { %s3011_s20 = sld [smem:[#allocation18_spill]] (%p2300_p12) }
 0x2f6   : > { %v1529_v21 = vld [vmem:[%s2619_s13] sm:$0xff] (%p2300_p12)  ;;  %v1533_v43 = vld [vmem:[%s2619_s13 + $0x10] sm:$0xff] (%p2300_p12) }
 0x2f7   : > { %v1531_v42 = vld [vmem:[%s2619_s13 + $0x8] sm:$0xff] (%p2300_p12)  ;;  %v1535_v44 = vld [vmem:[%s2619_s13 + $0x18] sm:$0xff] (%p2300_p12) }
 0x2f8   : > { %s1516_s0 = scalar_lea.vmem %s3011_s20, %s1755_s17 }
 0x2f9   : > { %1530 = vst [vmem:[%s1516_s0] sm:$0xff] %v1529_v21  ;;  %1532 = vst [vmem:[%s1516_s0 + $0x8] sm:$0xff] %v1531_v42 }
 0x2fa   : > { %1534 = vst [vmem:[%s1516_s0 + $0x20] sm:$0xff] %v1533_v43  ;;  %1536 = vst [vmem:[%s1516_s0 + $0x28] sm:$0xff] %v1535_v44 }
 0x2fb PF: > { %s17_s11 = sadd.s32 1, %s2163_s11   ;;  %s3012_s6 = sld [smem:[#allocation13_spill]] }
 0x2fc   : > { %p14_p8 = scmp.ge.s32.totalorder %s17_s11, 6   ;;  %s3013_s28 = sld [smem:[#allocation7_spill]] }
 0x2fd   : > { %s3014_s29 = sld [smem:[#allocation12_spill]]  ;;  %s3015_s30 = sld [smem:[#allocation8_spill]] }
 0x2fe   : > { %s3016_s8 = sld [smem:[#allocation9_spill]]  ;;  %s3017_s9 = sld [smem:[#allocation10_spill]] }
 0x2ff   : > { %s3018_s10 = sld [smem:[#allocation11_spill]]  ;;  %s3019_s24 = smov %s2127_s25 }
 0x300   : > { %s3020_s25 = smov %s2298_s7  ;;  %s3021_s26 = smov %s2135_s27 }
 0x301   : > { %s3022_s27 = smov %s3012_s6  ;;  %16 = sbr.rel (!%p14_p8) target bundleno = 12 (0xc), region = 183 }

</bundles_post_ra>
